<compile_context>
chip_gen: v7x
topology: tpu7x:2x2x1
jax: 0.10.0
libtpu: 0.0.40
codegen_flags: <defaults>
</compile_context>

<pallas_src>
import functools

import jax
import jax.numpy as jnp
from jax import lax
from jax.experimental import pallas as pl
from jax.experimental.pallas import tpu as pltpu

_SUBLANES_BF16 = 16  # bf16 packs 16 sublanes per vreg


def _resblock_kernel(xm_ref, xp_ref, xn_ref, w1_ref, b1_ref, w2_ref, b2_ref,
                     o_ref, *, W, TH, res_scale):
    """One (batch, row-block) step of the fused ResBlock.

    xm_ref: (1, Cin_p, TH*W)      current row block of x (f32)
    xp_ref: (1, Cin_p, HB)        flat chunk ending just above the block
    xn_ref: (1, Cin_p, HB)        flat chunk starting just below the block
    w1_ref: (3, Cmid_p, 3*Cin_p)  conv1 weights per ky (kx-major, Cin inner), bf16
    b1_ref: (Cmid_p, 1)           f32
    w2_ref: (3, Cout_p, 3*Cmid_p) bf16
    b2_ref: (Cout_p, 1)           f32
    o_ref : (1, Cout, TH*W)
    """
    h = pl.program_id(1)
    n_h = pl.num_programs(1)
    f32 = jnp.float32
    bf16 = jnp.bfloat16

    cin = xm_ref.shape[1]
    cmid = w1_ref.shape[1]
    s_out = TH * W              # flat size of the output row block
    s_mid = (TH + 2) * W        # conv1 is evaluated on TH+2 rows (conv2 halo)

    x_main = xm_ref[0]                                    # (Cin_p, TH*W) f32, residual

    # Two halo rows above / below the block; zeroed at the image border
    # (implements conv1's spatial zero padding across row-block edges).
    hb = xp_ref.shape[2]
    top2 = xp_ref[0, :, hb - 2 * W:].astype(bf16)         # rows h*TH-2, h*TH-1
    bot2 = xn_ref[0, :, :2 * W].astype(bf16)              # rows h*TH+TH, +TH+1
    top2 = jnp.where(h == 0, jnp.zeros_like(top2), top2)
    bot2 = jnp.where(h == n_h - 1, jnp.zeros_like(bot2), bot2)

    # Extended flat tile (bf16 MXU operand): xe[1 + r*W + c] == x[h*TH - 2 + r, c]
    # (0 off-image).  The leading/trailing zero absorbs the (ky,kx)=(0,0)/(2,2)
    # column underflow/overflow (those lanes are masked off anyway).
    zc_in = jnp.zeros((cin, 1), bf16)
    xe = jnp.concatenate([zc_in, top2, x_main.astype(bf16), bot2, zc_in], axis=1)

    # One iota; column masks (tap kx=0 invalid at col 0, kx=2 at col W-1).
    pos = lax.broadcasted_iota(jnp.int32, (1, s_mid), 1)
    col_mid = pos % W
    col_out = col_mid[:, :s_out]

    def ky_slab(src, ky, length, col):
        """(3*C, length) bf16 slab: the 3 kx taps of shifted row ky."""
        taps = []
        for kx in range(3):
            t = src[:, ky * W + kx: ky * W + kx + length]
            if kx == 0:
                t = jnp.where(col != 0, t, jnp.zeros_like(t))
            elif kx == 2:
                t = jnp.where(col != W - 1, t, jnp.zeros_like(t))
            taps.append(t)
        return jnp.concatenate(taps, axis=0)

    # ---- conv1 + bias + ReLU on TH+2 rows: 3 accumulating K=3*Cin matmuls ----
    y1 = jnp.dot(w1_ref[0], ky_slab(xe, 0, s_mid, col_mid),
                 preferred_element_type=f32)
    for ky in (1, 2):
        y1 = y1 + jnp.dot(w1_ref[ky], ky_slab(xe, ky, s_mid, col_mid),
                          preferred_element_type=f32)
    y1 = jnp.maximum(y1 + b1_ref[...], 0.0)               # (Cmid_p, S_mid) f32

    # conv2's vertical zero padding: mid-frame rows outside the image are zero
    # (only possible in the first / last row block).
    y1 = jnp.where((pos < W) & (h == 0), 0.0, y1)
    y1 = jnp.where((pos >= (TH + 1) * W) & (h == n_h - 1), 0.0, y1)

    zc_mid = jnp.zeros((cmid, 1), bf16)
    ye = jnp.concatenate([zc_mid, y1.astype(bf16), zc_mid], axis=1)

    # ---- conv2 + bias, residual scale & add ----
    acc2 = jnp.dot(w2_ref[0], ky_slab(ye, 0, s_out, col_out),
                   preferred_element_type=f32)
    for ky in (1, 2):
        acc2 = acc2 + jnp.dot(w2_ref[ky], ky_slab(ye, ky, s_out, col_out),
                              preferred_element_type=f32)
    acc2 = acc2 + b2_ref[...]

    co = o_ref.shape[1]                                    # exact (unpadded) Cout
    o_ref[0] = (acc2[:co] * res_scale + x_main[:co]).astype(o_ref.dtype)


def _round_up(v, m):
    return pl.cdiv(v, m) * m


def _vmem_capacity_bytes():
    """Per-core VMEM capacity; worst-case v7x 64 MiB if the query is unavailable."""
    try:
        cap = getattr(pltpu.get_tpu_info(), "vmem_capacity_bytes", None)
        if cap:
            return int(cap)
    except Exception:
        pass
    return 64 << 20


def _step_vmem_bytes(th, W, cin_p, cmid_p, cout_p, halo_lanes):
    """Rough per-grid-step VMEM footprint (pipeline buffers + live intermediates)."""
    s_out = th * W
    s_mid = (th + 2) * W
    b = 0
    b += 2 * cin_p * s_out * 4              # x_main block, double-buffered (f32)
    b += 2 * cout_p * s_out * 4             # output block, double-buffered (f32)
    b += 2 * 2 * cin_p * halo_lanes * 4     # two halo chunks, double-buffered
    b += cin_p * (s_mid + 2) * 2            # xe (bf16)
    b += 2 * 3 * cin_p * s_mid * 2          # conv1 per-ky slab (bf16, ~2 live)
    b += cmid_p * s_mid * 4                 # conv1 accumulator (f32)
    b += cmid_p * (s_mid + 2) * 2           # ye (bf16)
    b += 2 * 3 * cmid_p * s_out * 2         # conv2 per-ky slab (bf16, ~2 live)
    b += cout_p * s_out * 4                 # conv2 accumulator (f32)
    b += cin_p * s_out * 4                  # residual/store temp headroom
    b += 2 * 2 * (3 * cmid_p * 3 * cin_p + 3 * cout_p * 3 * cmid_p)  # bf16 weights x2 buf
    b += 2 * (cmid_p + cout_p) * 4          # biases
    return b


def _choose_tile_rows(H, W, cin_p, cmid_p, cout_p, halo, budget, n_batch):
    """Largest TH dividing H that fits the VMEM budget; >= 2 grid steps when N == 1."""
    hw = H * W
    valid, fitting = [], []
    for th in range(1, H + 1):
        if H % th:
            continue
        if H // th > 1 and (th * W) % halo:
            continue   # halo-chunk indexing needs the row block to hold whole chunks
        valid.append(th)
        if _step_vmem_bytes(th, W, cin_p, cmid_p, cout_p, min(halo, hw)) <= budget:
            fitting.append(th)
    cands = fitting if fitting else [min(valid)]
    if n_batch == 1:
        multi = [t for t in cands if H // t >= 2]   # keep both v7x TensorCores busy
        if multi:
            cands = multi
    return max(cands)


def resblock_pallas(x_nchw, w1, b1, w2, b2, *, res_scale=0.1, tile_rows=None):
    """ResBlock forward. x_nchw: (N, C, H, W) f32; w*: OIHW; b*: (O,)."""
    N, Cin, H, W = x_nchw.shape
    Cmid, Cin1, kh1, kw1 = w1.shape
    Cout, Cmid1, kh2, kw2 = w2.shape
    assert (kh1, kw1, kh2, kw2) == (3, 3, 3, 3), "kernel expects 3x3 convs"
    assert Cin1 == Cin and Cmid1 == Cmid
    assert Cout == Cin, "residual add requires in_channel == out_channel"
    assert H >= 2, "kernel expects at least 2 image rows"

    HW = H * W
    cin_p = _round_up(Cin, _SUBLANES_BF16)
    cmid_p = _round_up(Cmid, _SUBLANES_BF16)
    cout_p = cin_p                                       # residual: Cout == Cin

    halo = max(_round_up(2 * W, 128), 128)               # halo chunk size (lanes)
    hb = min(halo, HW)

    cap = _vmem_capacity_bytes()
    budget = int(cap * 0.6)
    if tile_rows is not None:
        TH = int(tile_rows)
        if H % TH or (H // TH > 1 and (TH * W) % halo):
            raise ValueError(
                f"tile_rows={TH} must divide H={H} and (tile_rows*W) must be a "
                f"multiple of the {halo}-lane halo chunk (or equal the whole image)")
    else:
        TH = _choose_tile_rows(H, W, cin_p, cmid_p, cout_p, halo, budget, N)
    nH = H // TH

    # Channel-pad activations/weights to the bf16 sublane multiple so every tap block
    # starts at an aligned sublane offset (no relayout shuffles); no-op when C%16==0.
    xf = x_nchw
    if cin_p != Cin:
        xf = jnp.pad(xf, ((0, 0), (0, cin_p - Cin), (0, 0), (0, 0)))
    xf = xf.reshape(N, cin_p, HW)

    def prep_w(w, co, ci, co_p, ci_p):
        if (co_p, ci_p) != (co, ci):
            w = jnp.pad(w, ((0, co_p - co), (0, ci_p - ci), (0, 0), (0, 0)))
        # OIHW -> (ky, O, kx, I) -> (3, O, 3*I): per-ky weight slabs, bf16 MXU operands.
        return jnp.transpose(w, (2, 0, 3, 1)).reshape(3, co_p, 3 * ci_p).astype(jnp.bfloat16)

    w1f = prep_w(w1, Cmid, Cin, cmid_p, cin_p)
    w2f = prep_w(w2, Cout, Cmid, cout_p, cmid_p)
    b1c = jnp.pad(b1, (0, cmid_p - Cmid)).reshape(cmid_p, 1).astype(jnp.float32)
    b2c = jnp.pad(b2, (0, cout_p - Cout)).reshape(cout_p, 1).astype(jnp.float32)

    x_main_spec = pl.BlockSpec((1, cin_p, TH * W), lambda n, h: (n, 0, h))
    if nH == 1:
        # Single row block: both halos lie outside the image and are zeroed in-kernel,
        # so fetch one minimal chunk per side instead of re-reading the whole image.
        x_prev_spec = pl.BlockSpec((1, cin_p, hb), lambda n, h: (n, 0, 0))
        x_next_spec = pl.BlockSpec((1, cin_p, hb), lambda n, h: (n, 0, 0))
    else:
        k = (TH * W) // halo               # halo chunks per row block
        n_chunks = HW // halo
        x_prev_spec = pl.BlockSpec(
            (1, cin_p, halo), lambda n, h: (n, 0, jnp.maximum(h * k - 1, 0)))
        x_next_spec = pl.BlockSpec(
            (1, cin_p, halo), lambda n, h: (n, 0, jnp.minimum((h + 1) * k, n_chunks - 1)))

    kernel = functools.partial(_resblock_kernel, W=W, TH=TH, res_scale=res_scale)

    est = _step_vmem_bytes(TH, W, cin_p, cmid_p, cout_p, hb)
    vmem_limit = int(min(max(cap * 0.7, est * 1.5), cap * 0.9))

    # NOTE: weight/bias blocks are grid-invariant (constant index_map), so Pallas does
    # not re-copy them; pinning them to a single buffer (pl.Buffered(1)) would save a
    # little more VMEM on v7x but is left out to keep the lowering conservative.
    out_flat = pl.pallas_call(
        kernel,
        out_shape=jax.ShapeDtypeStruct((N, Cout, HW), x_nchw.dtype),
        grid=(N, nH),
        in_specs=[
            x_main_spec,
            x_prev_spec,
            x_next_spec,
            pl.BlockSpec((3, cmid_p, 3 * cin_p), lambda n, h: (0, 0, 0)),
            pl.BlockSpec((cmid_p, 1), lambda n, h: (0, 0)),
            pl.BlockSpec((3, cout_p, 3 * cmid_p), lambda n, h: (0, 0, 0)),
            pl.BlockSpec((cout_p, 1), lambda n, h: (0, 0)),
        ],
        out_specs=pl.BlockSpec((1, Cout, TH * W), lambda n, h: (n, 0, h)),
        compiler_params=pltpu.CompilerParams(
            dimension_semantics=("parallel", "parallel"),
            vmem_limit_bytes=vmem_limit),
    )(xf, xf, xf, w1f, b1c, w2f, b2c)

    return out_flat.reshape(N, Cout, H, W)


def resblock_reference(x_nchw, w1, b1, w2, b2, *, res_scale=0.1):
    """Pure-JAX reference (NCHW, OIHW) matching the torch module."""
    dn = jax.lax.conv_dimension_numbers(x_nchw.shape, w1.shape,
                                        ("NCHW", "OIHW", "NCHW"))
    y = jax.lax.conv_general_dilated(x_nchw, w1, (1, 1), ((1, 1), (1, 1)),
                                     dimension_numbers=dn)
    y = y + b1.reshape(1, -1, 1, 1)
    y = jnp.maximum(y, 0.0)
    y = jax.lax.conv_general_dilated(y, w2, (1, 1), ((1, 1), (1, 1)),
                                     dimension_numbers=dn)
    y = y + b2.reshape(1, -1, 1, 1)
    return y * res_scale + x_nchw


if __name__ == "__main__":
    N, C, H, W = 2, 4, 16, 16
    key = jax.random.PRNGKey(0)
    kxx, k1, kb1, k2, kb2 = jax.random.split(key, 5)

    x = jax.random.normal(kxx, (N, C, H, W), dtype=jnp.float32)
    w1 = jax.random.normal(k1, (C, C, 3, 3), dtype=jnp.float32) * 0.1
    b1 = jax.random.normal(kb1, (C,), dtype=jnp.float32) * 0.1
    w2 = jax.random.normal(k2, (C, C, 3, 3), dtype=jnp.float32) * 0.1
    b2 = jax.random.normal(kb2, (C,), dtype=jnp.float32) * 0.1

    ref = jax.block_until_ready(resblock_reference(x, w1, b1, w2, b2))

    # 1) Row-block tiled path: tile_rows=8 -> grid (N, 2), exercises both the
    #    real-halo and the image-border (zeroed-halo) branches.
    out_tiled = jax.block_until_ready(
        resblock_pallas(x, w1, b1, w2, b2, tile_rows=8))
    assert out_tiled.shape == (N, C, H, W)
    err_t = jnp.max(jnp.abs(out_tiled - ref))
    assert jnp.allclose(out_tiled, ref, atol=2e-2, rtol=2e-2), \
        f"tiled max abs err {err_t}"

    # 2) Auto (VMEM-budgeted) tile path (bf16 MXU operands -> loosened tolerance).
    out_auto = jax.block_until_ready(resblock_pallas(x, w1, b1, w2, b2))
    err_a = jnp.max(jnp.abs(out_auto - ref))
    assert jnp.allclose(out_auto, ref, atol=2e-2, rtol=2e-2), \
        f"auto max abs err {err_a}"

    print("KERNEL_OK")
</pallas_src>

<mosaic_0001>
module attributes {stable_mosaic.version = 11 : i64} {
  func.func @_resblock_kernel(%arg0: i32, %arg1: i32, %arg2: memref<1x16x128xf32, #tpu.memory_space<vmem>>, %arg3: memref<1x16x128xf32, #tpu.memory_space<vmem>>, %arg4: memref<1x16x128xf32, #tpu.memory_space<vmem>>, %arg5: memref<3x16x48xbf16, #tpu.memory_space<vmem>>, %arg6: memref<16x1xf32, #tpu.memory_space<vmem>>, %arg7: memref<3x16x48xbf16, #tpu.memory_space<vmem>>, %arg8: memref<16x1xf32, #tpu.memory_space<vmem>>, %arg9: memref<1x4x128xf32, #tpu.memory_space<vmem>>) attributes {dimension_semantics = [#tpu.dimension_semantics<parallel>, #tpu.dimension_semantics<parallel>], iteration_bounds = array<i64: 2, 2>, scalar_prefetch = 0 : i64, scratch_operands = 0 : i64, tpu.core_type = #tpu.core_type<tc>, window_params = [{transform_indices = @transform_0, window_bounds = array<i64: 1, 16, 128>}, {transform_indices = @transform_1, window_bounds = array<i64: 1, 16, 128>}, {transform_indices = @transform_2, window_bounds = array<i64: 1, 16, 128>}, {pipeline_mode = #tpu.pipeline_mode<synchronous>, transform_indices = @transform_3, window_bounds = array<i64: 3, 16, 48>}, {pipeline_mode = #tpu.pipeline_mode<synchronous>, transform_indices = @transform_4, window_bounds = array<i64: 16, 1>}, {pipeline_mode = #tpu.pipeline_mode<synchronous>, transform_indices = @transform_5, window_bounds = array<i64: 3, 16, 48>}, {pipeline_mode = #tpu.pipeline_mode<synchronous>, transform_indices = @transform_6, window_bounds = array<i64: 16, 1>}, {transform_indices = @transform_7, window_bounds = array<i64: 1, 4, 128>}]} {
    %c0 = arith.constant 0 : index
    %c0_0 = arith.constant 0 : index
    %c0_1 = arith.constant 0 : index
    %0 = vector.load %arg2[%c0, %c0_0, %c0_1] : memref<1x16x128xf32, #tpu.memory_space<vmem>>, vector<1x16x128xf32>
    %1 = vector.shape_cast %0 : vector<1x16x128xf32> to vector<16x128xf32>
    %c0_2 = arith.constant 0 : index
    %c0_3 = arith.constant 0 : index
    %c96 = arith.constant 96 : index
    %2 = vector.load %arg3[%c0_2, %c0_3, %c96] : memref<1x16x128xf32, #tpu.memory_space<vmem>>, vector<1x16x32xf32>
    %3 = vector.shape_cast %2 : vector<1x16x32xf32> to vector<16x32xf32>
    %4 = arith.truncf %3 : vector<16x32xf32> to vector<16x32xbf16>
    %c0_4 = arith.constant 0 : index
    %c0_5 = arith.constant 0 : index
    %c0_6 = arith.constant 0 : index
    %5 = vector.load %arg4[%c0_4, %c0_5, %c0_6] : memref<1x16x128xf32, #tpu.memory_space<vmem>>, vector<1x16x32xf32>
    %6 = vector.shape_cast %5 : vector<1x16x32xf32> to vector<16x32xf32>
    %7 = arith.truncf %6 : vector<16x32xf32> to vector<16x32xbf16>
    %c0_i32 = arith.constant 0 : i32
    %8 = arith.cmpi eq, %arg1, %c0_i32 : i32
    %cst = arith.constant 0.000000e+00 : bf16
    %9 = vector.broadcast %cst : bf16 to vector<16x32xbf16>
    %10 = arith.select %8, %9, %4 : vector<16x32xbf16>
    %c1_i32 = arith.constant 1 : i32
    %11 = arith.cmpi eq, %arg1, %c1_i32 : i32
    %cst_7 = arith.constant 0.000000e+00 : bf16
    %12 = vector.broadcast %cst_7 : bf16 to vector<16x32xbf16>
    %13 = arith.select %11, %12, %7 : vector<16x32xbf16>
    %cst_8 = arith.constant 0.000000e+00 : bf16
    %14 = vector.broadcast %cst_8 : bf16 to vector<16x1xbf16>
    %15 = arith.truncf %1 : vector<16x128xf32> to vector<16x128xbf16>
    %16 = tpu.concatenate %14, %10, %15, %13, %14 in 1 : vector<16x1xbf16>, vector<16x32xbf16>, vector<16x128xbf16>, vector<16x32xbf16>, vector<16x1xbf16> -> vector<16x194xbf16>
    %17 = tpu.iota {dimensions = array<i32: 1>} : vector<1x160xi32>
    %c16_i32 = arith.constant 16 : i32
    %c0_i32_9 = arith.constant 0 : i32
    %18 = arith.cmpi eq, %c16_i32, %c0_i32_9 : i32
    %c1_i32_10 = arith.constant 1 : i32
    %19 = arith.select %18, %c1_i32_10, %c16_i32 : i32
    %20 = vector.broadcast %19 : i32 to vector<1x160xi32>
    %21 = arith.remsi %17, %20 : vector<1x160xi32>
    %c0_i32_11 = arith.constant 0 : i32
    %22 = vector.broadcast %c0_i32_11 : i32 to vector<1x160xi32>
    %23 = arith.cmpi ne, %21, %22 : vector<1x160xi32>
    %c0_i32_12 = arith.constant 0 : i32
    %24 = vector.broadcast %c0_i32_12 : i32 to vector<1x160xi32>
    %25 = arith.cmpi slt, %21, %24 : vector<1x160xi32>
    %c0_i32_13 = arith.constant 0 : i32
    %26 = arith.cmpi slt, %19, %c0_i32_13 : i32
    %27 = vector.broadcast %26 : i1 to vector<1x160xi1>
    %28 = vector.broadcast %27 : vector<1x160xi1> to vector<1x160xi1>
    %29 = arith.xori %25, %28 : vector<1x160xi1>
    %30 = arith.andi %29, %23 : vector<1x160xi1>
    %31 = vector.broadcast %19 : i32 to vector<1x160xi32>
    %32 = arith.addi %21, %31 : vector<1x160xi32>
    %33 = arith.select %30, %32, %21 : vector<1x160xi1>, vector<1x160xi32>
    %34 = vector.extract_strided_slice %33 {offsets = [0, 0], sizes = [1, 128], strides = [1, 1]} : vector<1x160xi32> to vector<1x128xi32>
    %c0_14 = arith.constant 0 : index
    %c0_15 = arith.constant 0 : index
    %c0_16 = arith.constant 0 : index
    %35 = vector.load %arg5[%c0_14, %c0_15, %c0_16] : memref<3x16x48xbf16, #tpu.memory_space<vmem>>, vector<1x16x48xbf16>
    %36 = vector.shape_cast %35 : vector<1x16x48xbf16> to vector<16x48xbf16>
    %37 = vector.extract_strided_slice %16 {offsets = [0, 0], sizes = [16, 160], strides = [1, 1]} : vector<16x194xbf16> to vector<16x160xbf16>
    %c0_i32_17 = arith.constant 0 : i32
    %38 = vector.broadcast %c0_i32_17 : i32 to vector<1x160xi32>
    %39 = arith.cmpi ne, %33, %38 : vector<1x160xi32>
    %cst_18 = arith.constant 0.000000e+00 : bf16
    %40 = vector.broadcast %cst_18 : bf16 to vector<16x160xbf16>
    %41 = vector.shape_cast %39 : vector<1x160xi1> to vector<1x160xi1>
    %42 = vector.broadcast %41 : vector<1x160xi1> to vector<16x160xi1>
    %43 = arith.select %42, %37, %40 : vector<16x160xi1>, vector<16x160xbf16>
    %44 = vector.extract_strided_slice %16 {offsets = [0, 1], sizes = [16, 160], strides = [1, 1]} : vector<16x194xbf16> to vector<16x160xbf16>
    %45 = vector.extract_strided_slice %16 {offsets = [0, 2], sizes = [16, 160], strides = [1, 1]} : vector<16x194xbf16> to vector<16x160xbf16>
    %c15_i32 = arith.constant 15 : i32
    %46 = vector.broadcast %c15_i32 : i32 to vector<1x160xi32>
    %47 = arith.cmpi ne, %33, %46 : vector<1x160xi32>
    %cst_19 = arith.constant 0.000000e+00 : bf16
    %48 = vector.broadcast %cst_19 : bf16 to vector<16x160xbf16>
    %49 = vector.shape_cast %47 : vector<1x160xi1> to vector<1x160xi1>
    %50 = vector.broadcast %49 : vector<1x160xi1> to vector<16x160xi1>
    %51 = arith.select %50, %45, %48 : vector<16x160xi1>, vector<16x160xbf16>
    %52 = tpu.concatenate %43, %44, %51 in 0 : vector<16x160xbf16>, vector<16x160xbf16>, vector<16x160xbf16> -> vector<48x160xbf16>
    %cst_20 = arith.constant dense<0.000000e+00> : vector<16x160xf32>
    %53 = tpu.matmul %36, %52, %cst_20 {dimension_numbers = #tpu.dot_dimension_numbers<[1], [0], [0], [1], [0, 0, 1, 1], [], []>} : vector<16x48xbf16>, vector<48x160xbf16>, vector<16x160xf32> -> vector<16x160xf32>
    %c1 = arith.constant 1 : index
    %c0_21 = arith.constant 0 : index
    %c0_22 = arith.constant 0 : index
    %54 = vector.load %arg5[%c1, %c0_21, %c0_22] : memref<3x16x48xbf16, #tpu.memory_space<vmem>>, vector<1x16x48xbf16>
    %55 = vector.shape_cast %54 : vector<1x16x48xbf16> to vector<16x48xbf16>
    %56 = vector.extract_strided_slice %16 {offsets = [0, 16], sizes = [16, 160], strides = [1, 1]} : vector<16x194xbf16> to vector<16x160xbf16>
    %c0_i32_23 = arith.constant 0 : i32
    %57 = vector.broadcast %c0_i32_23 : i32 to vector<1x160xi32>
    %58 = arith.cmpi ne, %33, %57 : vector<1x160xi32>
    %cst_24 = arith.constant 0.000000e+00 : bf16
    %59 = vector.broadcast %cst_24 : bf16 to vector<16x160xbf16>
    %60 = vector.shape_cast %58 : vector<1x160xi1> to vector<1x160xi1>
    %61 = vector.broadcast %60 : vector<1x160xi1> to vector<16x160xi1>
    %62 = arith.select %61, %56, %59 : vector<16x160xi1>, vector<16x160xbf16>
    %63 = vector.extract_strided_slice %16 {offsets = [0, 17], sizes = [16, 160], strides = [1, 1]} : vector<16x194xbf16> to vector<16x160xbf16>
    %64 = vector.extract_strided_slice %16 {offsets = [0, 18], sizes = [16, 160], strides = [1, 1]} : vector<16x194xbf16> to vector<16x160xbf16>
    %c15_i32_25 = arith.constant 15 : i32
    %65 = vector.broadcast %c15_i32_25 : i32 to vector<1x160xi32>
    %66 = arith.cmpi ne, %33, %65 : vector<1x160xi32>
    %cst_26 = arith.constant 0.000000e+00 : bf16
    %67 = vector.broadcast %cst_26 : bf16 to vector<16x160xbf16>
    %68 = vector.shape_cast %66 : vector<1x160xi1> to vector<1x160xi1>
    %69 = vector.broadcast %68 : vector<1x160xi1> to vector<16x160xi1>
    %70 = arith.select %69, %64, %67 : vector<16x160xi1>, vector<16x160xbf16>
    %71 = tpu.concatenate %62, %63, %70 in 0 : vector<16x160xbf16>, vector<16x160xbf16>, vector<16x160xbf16> -> vector<48x160xbf16>
    %cst_27 = arith.constant dense<0.000000e+00> : vector<16x160xf32>
    %72 = tpu.matmul %55, %71, %cst_27 {dimension_numbers = #tpu.dot_dimension_numbers<[1], [0], [0], [1], [0, 0, 1, 1], [], []>} : vector<16x48xbf16>, vector<48x160xbf16>, vector<16x160xf32> -> vector<16x160xf32>
    %73 = arith.addf %53, %72 : vector<16x160xf32>
    %c2 = arith.constant 2 : index
    %c0_28 = arith.constant 0 : index
    %c0_29 = arith.constant 0 : index
    %74 = vector.load %arg5[%c2, %c0_28, %c0_29] : memref<3x16x48xbf16, #tpu.memory_space<vmem>>, vector<1x16x48xbf16>
    %75 = vector.shape_cast %74 : vector<1x16x48xbf16> to vector<16x48xbf16>
    %76 = vector.extract_strided_slice %16 {offsets = [0, 32], sizes = [16, 160], strides = [1, 1]} : vector<16x194xbf16> to vector<16x160xbf16>
    %c0_i32_30 = arith.constant 0 : i32
    %77 = vector.broadcast %c0_i32_30 : i32 to vector<1x160xi32>
    %78 = arith.cmpi ne, %33, %77 : vector<1x160xi32>
    %cst_31 = arith.constant 0.000000e+00 : bf16
    %79 = vector.broadcast %cst_31 : bf16 to vector<16x160xbf16>
    %80 = vector.shape_cast %78 : vector<1x160xi1> to vector<1x160xi1>
    %81 = vector.broadcast %80 : vector<1x160xi1> to vector<16x160xi1>
    %82 = arith.select %81, %76, %79 : vector<16x160xi1>, vector<16x160xbf16>
    %83 = vector.extract_strided_slice %16 {offsets = [0, 33], sizes = [16, 160], strides = [1, 1]} : vector<16x194xbf16> to vector<16x160xbf16>
    %84 = vector.extract_strided_slice %16 {offsets = [0, 34], sizes = [16, 160], strides = [1, 1]} : vector<16x194xbf16> to vector<16x160xbf16>
    %c15_i32_32 = arith.constant 15 : i32
    %85 = vector.broadcast %c15_i32_32 : i32 to vector<1x160xi32>
    %86 = arith.cmpi ne, %33, %85 : vector<1x160xi32>
    %cst_33 = arith.constant 0.000000e+00 : bf16
    %87 = vector.broadcast %cst_33 : bf16 to vector<16x160xbf16>
    %88 = vector.shape_cast %86 : vector<1x160xi1> to vector<1x160xi1>
    %89 = vector.broadcast %88 : vector<1x160xi1> to vector<16x160xi1>
    %90 = arith.select %89, %84, %87 : vector<16x160xi1>, vector<16x160xbf16>
    %91 = tpu.concatenate %82, %83, %90 in 0 : vector<16x160xbf16>, vector<16x160xbf16>, vector<16x160xbf16> -> vector<48x160xbf16>
    %cst_34 = arith.constant dense<0.000000e+00> : vector<16x160xf32>
    %92 = tpu.matmul %75, %91, %cst_34 {dimension_numbers = #tpu.dot_dimension_numbers<[1], [0], [0], [1], [0, 0, 1, 1], [], []>} : vector<16x48xbf16>, vector<48x160xbf16>, vector<16x160xf32> -> vector<16x160xf32>
    %93 = arith.addf %73, %92 : vector<16x160xf32>
    %c0_35 = arith.constant 0 : index
    %c0_36 = arith.constant 0 : index
    %94 = vector.load %arg6[%c0_35, %c0_36] : memref<16x1xf32, #tpu.memory_space<vmem>>, vector<16x1xf32>
    %95 = vector.broadcast %94 : vector<16x1xf32> to vector<16x160xf32>
    %96 = arith.addf %93, %95 : vector<16x160xf32>
    %cst_37 = arith.constant 0.000000e+00 : f32
    %97 = vector.broadcast %cst_37 : f32 to vector<16x160xf32>
    %98 = arith.maximumf %96, %97 : vector<16x160xf32>
    %c16_i32_38 = arith.constant 16 : i32
    %99 = vector.broadcast %c16_i32_38 : i32 to vector<1x160xi32>
    %100 = arith.cmpi slt, %17, %99 : vector<1x160xi32>
    %c0_i32_39 = arith.constant 0 : i32
    %101 = arith.cmpi eq, %arg1, %c0_i32_39 : i32
    %102 = vector.broadcast %101 : i1 to vector<1x160xi1>
    %103 = arith.andi %100, %102 : vector<1x160xi1>
    %cst_40 = arith.constant 0.000000e+00 : f32
    %104 = vector.shape_cast %103 : vector<1x160xi1> to vector<1x160xi1>
    %105 = vector.broadcast %104 : vector<1x160xi1> to vector<16x160xi1>
    %106 = vector.broadcast %cst_40 : f32 to vector<16x160xf32>
    %107 = arith.select %105, %106, %98 : vector<16x160xi1>, vector<16x160xf32>
    %c144_i32 = arith.constant 144 : i32
    %108 = vector.broadcast %c144_i32 : i32 to vector<1x160xi32>
    %109 = arith.cmpi sge, %17, %108 : vector<1x160xi32>
    %c1_i32_41 = arith.constant 1 : i32
    %110 = arith.cmpi eq, %arg1, %c1_i32_41 : i32
    %111 = vector.broadcast %110 : i1 to vector<1x160xi1>
    %112 = arith.andi %109, %111 : vector<1x160xi1>
    %cst_42 = arith.constant 0.000000e+00 : f32
    %113 = vector.shape_cast %112 : vector<1x160xi1> to vector<1x160xi1>
    %114 = vector.broadcast %113 : vector<1x160xi1> to vector<16x160xi1>
    %115 = vector.broadcast %cst_42 : f32 to vector<16x160xf32>
    %116 = arith.select %114, %115, %107 : vector<16x160xi1>, vector<16x160xf32>
    %cst_43 = arith.constant 0.000000e+00 : bf16
    %117 = vector.broadcast %cst_43 : bf16 to vector<16x1xbf16>
    %118 = arith.truncf %116 : vector<16x160xf32> to vector<16x160xbf16>
    %119 = tpu.concatenate %117, %118, %117 in 1 : vector<16x1xbf16>, vector<16x160xbf16>, vector<16x1xbf16> -> vector<16x162xbf16>
    %c0_44 = arith.constant 0 : index
    %c0_45 = arith.constant 0 : index
    %c0_46 = arith.constant 0 : index
    %120 = vector.load %arg7[%c0_44, %c0_45, %c0_46] : memref<3x16x48xbf16, #tpu.memory_space<vmem>>, vector<1x16x48xbf16>
    %121 = vector.shape_cast %120 : vector<1x16x48xbf16> to vector<16x48xbf16>
    %122 = vector.extract_strided_slice %119 {offsets = [0, 0], sizes = [16, 128], strides = [1, 1]} : vector<16x162xbf16> to vector<16x128xbf16>
    %c0_i32_47 = arith.constant 0 : i32
    %123 = vector.broadcast %c0_i32_47 : i32 to vector<1x128xi32>
    %124 = arith.cmpi ne, %34, %123 : vector<1x128xi32>
    %cst_48 = arith.constant 0.000000e+00 : bf16
    %125 = vector.broadcast %cst_48 : bf16 to vector<16x128xbf16>
    %126 = vector.shape_cast %124 : vector<1x128xi1> to vector<1x128xi1>
    %127 = vector.broadcast %126 : vector<1x128xi1> to vector<16x128xi1>
    %128 = arith.select %127, %122, %125 : vector<16x128xi1>, vector<16x128xbf16>
    %129 = vector.extract_strided_slice %119 {offsets = [0, 1], sizes = [16, 128], strides = [1, 1]} : vector<16x162xbf16> to vector<16x128xbf16>
    %130 = vector.extract_strided_slice %119 {offsets = [0, 2], sizes = [16, 128], strides = [1, 1]} : vector<16x162xbf16> to vector<16x128xbf16>
    %c15_i32_49 = arith.constant 15 : i32
    %131 = vector.broadcast %c15_i32_49 : i32 to vector<1x128xi32>
    %132 = arith.cmpi ne, %34, %131 : vector<1x128xi32>
    %cst_50 = arith.constant 0.000000e+00 : bf16
    %133 = vector.broadcast %cst_50 : bf16 to vector<16x128xbf16>
    %134 = vector.shape_cast %132 : vector<1x128xi1> to vector<1x128xi1>
    %135 = vector.broadcast %134 : vector<1x128xi1> to vector<16x128xi1>
    %136 = arith.select %135, %130, %133 : vector<16x128xi1>, vector<16x128xbf16>
    %137 = tpu.concatenate %128, %129, %136 in 0 : vector<16x128xbf16>, vector<16x128xbf16>, vector<16x128xbf16> -> vector<48x128xbf16>
    %cst_51 = arith.constant dense<0.000000e+00> : vector<16x128xf32>
    %138 = tpu.matmul %121, %137, %cst_51 {dimension_numbers = #tpu.dot_dimension_numbers<[1], [0], [0], [1], [0, 0, 1, 1], [], []>} : vector<16x48xbf16>, vector<48x128xbf16>, vector<16x128xf32> -> vector<16x128xf32>
    %c1_52 = arith.constant 1 : index
    %c0_53 = arith.constant 0 : index
    %c0_54 = arith.constant 0 : index
    %139 = vector.load %arg7[%c1_52, %c0_53, %c0_54] : memref<3x16x48xbf16, #tpu.memory_space<vmem>>, vector<1x16x48xbf16>
    %140 = vector.shape_cast %139 : vector<1x16x48xbf16> to vector<16x48xbf16>
    %141 = vector.extract_strided_slice %119 {offsets = [0, 16], sizes = [16, 128], strides = [1, 1]} : vector<16x162xbf16> to vector<16x128xbf16>
    %c0_i32_55 = arith.constant 0 : i32
    %142 = vector.broadcast %c0_i32_55 : i32 to vector<1x128xi32>
    %143 = arith.cmpi ne, %34, %142 : vector<1x128xi32>
    %cst_56 = arith.constant 0.000000e+00 : bf16
    %144 = vector.broadcast %cst_56 : bf16 to vector<16x128xbf16>
    %145 = vector.shape_cast %143 : vector<1x128xi1> to vector<1x128xi1>
    %146 = vector.broadcast %145 : vector<1x128xi1> to vector<16x128xi1>
    %147 = arith.select %146, %141, %144 : vector<16x128xi1>, vector<16x128xbf16>
    %148 = vector.extract_strided_slice %119 {offsets = [0, 17], sizes = [16, 128], strides = [1, 1]} : vector<16x162xbf16> to vector<16x128xbf16>
    %149 = vector.extract_strided_slice %119 {offsets = [0, 18], sizes = [16, 128], strides = [1, 1]} : vector<16x162xbf16> to vector<16x128xbf16>
    %c15_i32_57 = arith.constant 15 : i32
    %150 = vector.broadcast %c15_i32_57 : i32 to vector<1x128xi32>
    %151 = arith.cmpi ne, %34, %150 : vector<1x128xi32>
    %cst_58 = arith.constant 0.000000e+00 : bf16
    %152 = vector.broadcast %cst_58 : bf16 to vector<16x128xbf16>
    %153 = vector.shape_cast %151 : vector<1x128xi1> to vector<1x128xi1>
    %154 = vector.broadcast %153 : vector<1x128xi1> to vector<16x128xi1>
    %155 = arith.select %154, %149, %152 : vector<16x128xi1>, vector<16x128xbf16>
    %156 = tpu.concatenate %147, %148, %155 in 0 : vector<16x128xbf16>, vector<16x128xbf16>, vector<16x128xbf16> -> vector<48x128xbf16>
    %cst_59 = arith.constant dense<0.000000e+00> : vector<16x128xf32>
    %157 = tpu.matmul %140, %156, %cst_59 {dimension_numbers = #tpu.dot_dimension_numbers<[1], [0], [0], [1], [0, 0, 1, 1], [], []>} : vector<16x48xbf16>, vector<48x128xbf16>, vector<16x128xf32> -> vector<16x128xf32>
    %158 = arith.addf %138, %157 : vector<16x128xf32>
    %c2_60 = arith.constant 2 : index
    %c0_61 = arith.constant 0 : index
    %c0_62 = arith.constant 0 : index
    %159 = vector.load %arg7[%c2_60, %c0_61, %c0_62] : memref<3x16x48xbf16, #tpu.memory_space<vmem>>, vector<1x16x48xbf16>
    %160 = vector.shape_cast %159 : vector<1x16x48xbf16> to vector<16x48xbf16>
    %161 = vector.extract_strided_slice %119 {offsets = [0, 32], sizes = [16, 128], strides = [1, 1]} : vector<16x162xbf16> to vector<16x128xbf16>
    %c0_i32_63 = arith.constant 0 : i32
    %162 = vector.broadcast %c0_i32_63 : i32 to vector<1x128xi32>
    %163 = arith.cmpi ne, %34, %162 : vector<1x128xi32>
    %cst_64 = arith.constant 0.000000e+00 : bf16
    %164 = vector.broadcast %cst_64 : bf16 to vector<16x128xbf16>
    %165 = vector.shape_cast %163 : vector<1x128xi1> to vector<1x128xi1>
    %166 = vector.broadcast %165 : vector<1x128xi1> to vector<16x128xi1>
    %167 = arith.select %166, %161, %164 : vector<16x128xi1>, vector<16x128xbf16>
    %168 = vector.extract_strided_slice %119 {offsets = [0, 33], sizes = [16, 128], strides = [1, 1]} : vector<16x162xbf16> to vector<16x128xbf16>
    %169 = vector.extract_strided_slice %119 {offsets = [0, 34], sizes = [16, 128], strides = [1, 1]} : vector<16x162xbf16> to vector<16x128xbf16>
    %c15_i32_65 = arith.constant 15 : i32
    %170 = vector.broadcast %c15_i32_65 : i32 to vector<1x128xi32>
    %171 = arith.cmpi ne, %34, %170 : vector<1x128xi32>
    %cst_66 = arith.constant 0.000000e+00 : bf16
    %172 = vector.broadcast %cst_66 : bf16 to vector<16x128xbf16>
    %173 = vector.shape_cast %171 : vector<1x128xi1> to vector<1x128xi1>
    %174 = vector.broadcast %173 : vector<1x128xi1> to vector<16x128xi1>
    %175 = arith.select %174, %169, %172 : vector<16x128xi1>, vector<16x128xbf16>
    %176 = tpu.concatenate %167, %168, %175 in 0 : vector<16x128xbf16>, vector<16x128xbf16>, vector<16x128xbf16> -> vector<48x128xbf16>
    %cst_67 = arith.constant dense<0.000000e+00> : vector<16x128xf32>
    %177 = tpu.matmul %160, %176, %cst_67 {dimension_numbers = #tpu.dot_dimension_numbers<[1], [0], [0], [1], [0, 0, 1, 1], [], []>} : vector<16x48xbf16>, vector<48x128xbf16>, vector<16x128xf32> -> vector<16x128xf32>
    %178 = arith.addf %158, %177 : vector<16x128xf32>
    %c0_68 = arith.constant 0 : index
    %c0_69 = arith.constant 0 : index
    %179 = vector.load %arg8[%c0_68, %c0_69] : memref<16x1xf32, #tpu.memory_space<vmem>>, vector<16x1xf32>
    %180 = vector.broadcast %179 : vector<16x1xf32> to vector<16x128xf32>
    %181 = arith.addf %178, %180 : vector<16x128xf32>
    %182 = vector.extract_strided_slice %181 {offsets = [0, 0], sizes = [4, 128], strides = [1, 1]} : vector<16x128xf32> to vector<4x128xf32>
    %cst_70 = arith.constant 1.000000e-01 : f32
    %183 = vector.broadcast %cst_70 : f32 to vector<4x128xf32>
    %184 = arith.mulf %182, %183 : vector<4x128xf32>
    %185 = vector.extract_strided_slice %1 {offsets = [0, 0], sizes = [4, 128], strides = [1, 1]} : vector<16x128xf32> to vector<4x128xf32>
    %186 = arith.addf %184, %185 : vector<4x128xf32>
    %c0_71 = arith.constant 0 : index
    %c0_72 = arith.constant 0 : index
    %c0_73 = arith.constant 0 : index
    %187 = vector.load %arg9[%c0_71, %c0_72, %c0_73] : memref<1x4x128xf32, #tpu.memory_space<vmem>>, vector<1x4x128xf32>
    %188 = vector.shape_cast %187 : vector<1x4x128xf32> to vector<4x128xf32>
    %189 = vector.shape_cast %186 : vector<4x128xf32> to vector<1x4x128xf32>
    tpu.vector_store %arg9[%c0_71, %c0_72, %c0_73], %189 {strides = array<i32>} : memref<1x4x128xf32, #tpu.memory_space<vmem>>, vector<1x4x128xf32>,
    return
  }
  func.func @transform_0(%arg0: i32, %arg1: i32) -> (i32, i32, i32) {
    %c0_i32 = arith.constant 0 : i32
    %c0_i32_0 = arith.constant 0 : i32
    return %arg0, %c0_i32, %arg1 : i32, i32, i32
  }
  func.func @transform_1(%arg0: i32, %arg1: i32) -> (i32, i32, i32) {
    %c1_i32 = arith.constant 1 : i32
    %0 = arith.muli %arg1, %c1_i32 : i32
    %c1_i32_0 = arith.constant 1 : i32
    %1 = arith.subi %0, %c1_i32_0 : i32
    %c0_i32 = arith.constant 0 : i32
    %2 = arith.maxsi %1, %c0_i32 : i32
    %c0_i32_1 = arith.constant 0 : i32
    %c0_i32_2 = arith.constant 0 : i32
    return %arg0, %c0_i32_1, %2 : i32, i32, i32
  }
  func.func @transform_2(%arg0: i32, %arg1: i32) -> (i32, i32, i32) {
    %c1_i32 = arith.constant 1 : i32
    %0 = arith.addi %arg1, %c1_i32 : i32
    %c1_i32_0 = arith.constant 1 : i32
    %1 = arith.muli %0, %c1_i32_0 : i32
    %c1_i32_1 = arith.constant 1 : i32
    %2 = arith.minsi %1, %c1_i32_1 : i32
    %c0_i32 = arith.constant 0 : i32
    %c0_i32_2 = arith.constant 0 : i32
    return %arg0, %c0_i32, %2 : i32, i32, i32
  }
  func.func @transform_3(%arg0: i32, %arg1: i32) -> (i32, i32, i32) {
    %c0_i32 = arith.constant 0 : i32
    %c0_i32_0 = arith.constant 0 : i32
    %c0_i32_1 = arith.constant 0 : i32
    %c0_i32_2 = arith.constant 0 : i32
    return %c0_i32, %c0_i32_0, %c0_i32_1 : i32, i32, i32
  }
  func.func @transform_4(%arg0: i32, %arg1: i32) -> (i32, i32) {
    %c0_i32 = arith.constant 0 : i32
    %c0_i32_0 = arith.constant 0 : i32
    %c0_i32_1 = arith.constant 0 : i32
    return %c0_i32, %c0_i32_0 : i32, i32
  }
  func.func @transform_5(%arg0: i32, %arg1: i32) -> (i32, i32, i32) {
    %c0_i32 = arith.constant 0 : i32
    %c0_i32_0 = arith.constant 0 : i32
    %c0_i32_1 = arith.constant 0 : i32
    %c0_i32_2 = arith.constant 0 : i32
    return %c0_i32, %c0_i32_0, %c0_i32_1 : i32, i32, i32
  }
  func.func @transform_6(%arg0: i32, %arg1: i32) -> (i32, i32) {
    %c0_i32 = arith.constant 0 : i32
    %c0_i32_0 = arith.constant 0 : i32
    %c0_i32_1 = arith.constant 0 : i32
    return %c0_i32, %c0_i32_0 : i32, i32
  }
  func.func @transform_7(%arg0: i32, %arg1: i32) -> (i32, i32, i32) {
    %c0_i32 = arith.constant 0 : i32
    %c0_i32_0 = arith.constant 0 : i32
    return %arg0, %c0_i32, %arg1 : i32, i32, i32
  }
}

</mosaic_0001>

<bundles_post_ra>
// kernel: tpu_custom_call.1
= control target key start
LH: loop header
LB: loop body
LE: loop exit
PB: predicated region body
PF: predicated region fallthrough
CT: control target
= control target key end

     0   :  { %s2560_s0 = inlined_call_operand.hbm [shape: f32[2,16,256], index: 0, kind: input, shape index: {}]   ;;  %s2561_s1 = inlined_call_operand.hbm [shape: f32[2,16,256], index: 1, kind: input, shape index: {}]   ;;  %s2562_s2 = inlined_call_operand.hbm [shape: f32[2,16,256], index: 2, kind: input, shape index: {}]   ;;  %s2563_s3 = inlined_call_operand.vmem [shape: bf16[3,16,48], index: 3, kind: input, shape index: {}]   ;;  %s2564_s4 = inlined_call_operand.vmem [shape: f32[16,1], index: 4, kind: input, shape index: {}]   ;;  %s2565_s5 = inlined_call_operand.vmem [shape: bf16[3,16,48], index: 5, kind: input, shape index: {}]   ;;  %s2566_s6 = inlined_call_operand.vmem [shape: f32[16,1], index: 6, kind: input, shape index: {}]   ;;  %s2567_s7 = inlined_call_operand.hbm [shape: f32[2,4,256], index: 7, kind: output, shape index: {}]  }
   0x1   :  { %2594 = sst [smem:[#allocation23_spill]] %s2560_s0 }
   0x2   :  { %2595 = sst [smem:[#allocation24_spill]] %s2561_s1 }
   0x3   :  { %2596 = sst [smem:[#allocation25_spill]] %s2563_s3 }
   0x4   :  { %2597 = sst [smem:[#allocation26_spill]] %s2564_s4 }
   0x5   :  { %2598 = sst [smem:[#allocation27_spill]] %s2565_s5 }
   0x6   :  { %2599 = sst [smem:[#allocation28_spill]] %s2566_s6 }
   0x7   :  { %2600 = sst [smem:[#allocation29_spill]] %s2567_s7 }
   0x8   :  { %12 = vsyncpa [#allocation3], 0 }
   0x9   :  { %14 = vsyncpa [#allocation3 + $0x1], 0 }
   0xa   :  { %15 = vsyncpa [#allocation6], 0 }
   0xb   :  { %17 = vsyncpa [#allocation6 + $0x1], 0 }
   0xc   :  { %18 = vsyncpa [#allocation4], 0 }
   0xd   :  { %20 = vsyncpa [#allocation4 + $0x1], 0  ;;  %s1875_s24 = smov 0   ;;  %s1877_s25 = smov 0  }
   0xe   :  { %s1879_s26 = smov 0   ;;  %s1881_s27 = smov 0  }
   0xf   :  { %s1883_s28 = smov 0   ;;  %s1885_s29 = smov 0  }
  0x10   :  { %s1887_s30 = smov 0   ;;  %s1889_s8 = smov 0  }
  0x11   :  { %s1891_s9 = smov 0   ;;  %s1893_s10 = smov 0  }
  0x12   :  { %s1895_s11 = smov 0   ;;  %s1897_s12 = smov 0  }
  0x13   :  { %s1899_s13 = smov 0   ;;  %s1901_s14 = smov 0  }
  0x14 LB: > { %2601 = sst [smem:[#allocation13_spill]] %s1780_s29  ;;  %s1944_s15 = sadd.s32 4294967295, %s1812_s14   ;;  %s1812_s14 = sphi %s1901_s14, %s26_s14   ;;  %s1808_s13 = sphi %s1899_s13, %s2680_s13   ;;  %s1804_s12 = sphi %s1897_s12, %s2669_s12   ;;  %s1800_s11 = sphi %s1895_s11, %s2679_s11   ;;  %s1796_s10 = sphi %s1893_s10, %s2678_s10   ;;  %s1792_s9 = sphi %s1891_s9, %s2667_s9   ;;  %s1788_s8 = sphi %s1889_s8, %s2677_s8   ;;  %s1784_s30 = sphi %s1887_s30, %s2676_s30   ;;  %s1780_s29 = sphi %s1885_s29, %s2665_s29   ;;  %s1776_s28 = sphi %s1883_s28, %s2675_s28   ;;  %s1772_s27 = sphi %s1881_s27, %s2674_s27   ;;  %s1768_s26 = sphi %s1879_s26, %s2673_s26   ;;  %s1764_s25 = sphi %s1877_s25, %s2672_s25   ;;  %s1760_s24 = sphi %s1875_s24, %s2671_s24  }
  0x15   : > { %2602 = sst [smem:[#allocation14_spill]] %s1792_s9  ;;  %s35_s16 = sadd.s32 1, %s1804_s12 }
  0x16   : > { %2603 = sst [smem:[#allocation15_spill]] %s1796_s10  ;;  %p36_p0 = scmp.ge.s32.totalorder %s35_s16, 2 }
  0x17   : > { %2604 = sst [smem:[#allocation16_spill]] %s1800_s11  ;;  %s38_s17 = sadd.s32 1, %s1808_s13 }
  0x18   : > { %2605 = sst [smem:[#allocation17_spill]] %s1804_s12  ;;  %p2579_p1 = scmp.eq.s32.totalorder %s1812_s14, 0 }
  0x19   : > { %p2578_p2 = scmp.eq.s32.totalorder %s1944_s15, 0  ;;  %s2682_s16 = smov (%p36_p0, %s35_s16), 0 }
  0x1a   : > { %2606 = sst [smem:[#allocation18_spill]] %s2682_s16  ;;  %s2684_s17 = smov (!%p36_p0, %s38_s17), %s1808_s13 }
  0x1b   : > { %s43_s18 = ssub.s32 %s1804_s12, %s2682_s16  ;;  %p40_p3 = scmp.ge.s32.totalorder %s2684_s17, 2 }
  0x1c   : > { %s81_s19 = sadd.s32 1, %s1780_s29  ;;  %p88_p4 = scmp.ne.s32.totalorder %s1780_s29, %s1776_s28 }
  0x1d   : > { %s2686_s17 = smov (%p40_p3, %s2684_s17), 0  ;;  %p94_p6 = scmp.ne.s32.totalorder %s1776_s28, %s1772_s27 }
  0x1e   : > { %2607 = sst [smem:[#allocation19_spill]] %s2686_s17  ;;  %s1960_s20 = ssub.s32 %s1808_s13, %s2686_s17 }
  0x1f   : > { %s1963_s21 = sor.u32 %s43_s18, %s1960_s20  ;;  %p1971_p7 = por %p88_p4, %p2579_p1 }
  0x20   : > { %p1977_p8 = por %p94_p6, %p2578_p2  ;;  %p2577_p9 = scmp.lt.s32.totalorder %s1812_s14, 4 }
  0x21   : > { %p2576_p10 = scmp.eq.s32.totalorder %s1960_s20, 0  ;;  %s1313_s18 = sshll.u32 %s1808_s13, 2 }
  0x22   : > { %s2609_s23 = scalar_select %p1977_p8, 1, 0 }
  0x23   : > { %s1987_s17 = scalar_select %p2576_p10, %s1780_s29, %s81_s19  }
  0x24   : > { %s298_s27 = sand.u32 1, %s1812_s14   ;;  %s300_s16 = sand.u32 1, %s1780_s29  }
  0x25   : > { %2610 = sst [smem:[#allocation20_spill]] %s1987_s17  ;;  %s1315_s7 = sshll.u32 %s300_s16, 4 }
  0x26   : > { %s2575_s11 = sshll.u32 %s1808_s13, 9  ;;  %s2611_s1 = sld [smem:[#allocation24_spill]] }
  0x27   : > { %s302_s4 = scalar_lea.vmem [#allocation5], %s1315_s7  ;;  %p2005_p11 = pnand %p2577_p9, %p1971_p7 }
  0x28   : > { %s313_s10 = sshll.u32 %s302_s4, 4  ;;  %s2011_s5 = scalar_lea.sflag [#allocation6], %s298_s27  ;;  %s1999_s10 = int_to_ptr.vmem [resolvable:$true] %s313_s10 }
  0x29   : > { %p1566_p3 = pneg %p2005_p11 }
  0x2c   : > { %s1997_s3 = scalar_lea.hbm %s2611_s1, %s2575_s11  ;;  %s1569_s16 = scalar_lea.hbm %s2611_s1, 1024 }
  0x2d   : > { %s1564_s6 = scalar_lea.hbm %s1997_s3, 256  ;;  %p1570_p7 = scmp.lt.u32.totalorder %s1997_s3, %s2611_s1 }
  0x2e   : > { %p1565_p0 = scmp.ne.s32.totalorder %s1997_s3, %s1564_s6  ;;  %p1571_p10 = scmp.lt.u32.totalorder %s1569_s16, %s1564_s6 }
  0x2f   : > { %p1573_p2 = scmp.lt.u32.totalorder %s1564_s6, %s1997_s3 }
  0x30   : > { %p1567_p4 = pnand %p1566_p3, %p1565_p0  ;;  %p1572_p9 = por %p1571_p10, %p1570_p7 }
  0x32   : > { %p1568_p6 = pneg %p1567_p4  ;;  %p1574_p1 = por %p1573_p2, %p1572_p9 }
  0x34   : > { %p1575_p5 = pnand %p1574_p1, %p1568_p6 }
  0x36   : > { %1578 = shalt.err (!%p1575_p5)
}
  0x37   : > { %s1579_s27 = scalar_lea.vmem %s1999_s10, 256  ;;  %s1814_s4 = smov [#allocation5]  }
  0x38   : > { %p1580_p0 = scmp.ne.s32.totalorder %s1999_s10, %s1579_s27  ;;  %s1584_s7 = sshll.u32 %s1814_s4, 4  ;;  %s1585_s7 = int_to_ptr.vmem [resolvable:$false] %s1584_s7 }
  0x39   : > { %s1586_s11 = scalar_lea.vmem %s1585_s7, 512  ;;  %p1587_p13 = scmp.lt.s32.totalorder %s1999_s10, %s1585_s7 }
  0x3a   : > { %p1582_p4 = pnand %p1580_p0, %p1566_p3  ;;  %p1588_p10 = scmp.lt.s32.totalorder %s1586_s11, %s1579_s27 }
  0x3c   : > { %p1583_p12 = pneg %p1582_p4  ;;  %p1589_p7 = por %p1588_p10, %p1587_p13 }
  0x3e   : > { %p1590_p2 = pnand %p1589_p7, %p1583_p12 }
  0x40   : > { %1593 = shalt.err (!%p1590_p2)
}
  0x41   : > { %s2580_s6 = smov 256   ;;  %s2582_s16 = smov 128  }
  0x42   : > { %s2584_s22 = smov 8   ;;  %p2613_p1 = scmp.lt.s32.totalorder %s1812_s14, 5 }
  0x43   : > { %1417 = dma.hbm_to_vmem [thread:$0]  (!%p2005_p11), %s1997_s3, 256, %s1999_s10, %s2011_s5, %s2580_s6, %s2582_s16, %s2584_s22  }
  0x44   : > { %p2614_p5 = scmp.ge.s32.totalorder %s1812_s14, 1  ;;  %s1307_s4 = sadd.s32 4294967294, %s1812_s14  }
  0x45   : > { %s47_s7 = sadd.s32 1, %s1792_s9  ;;  %p2616_p12 = scmp.eq.s32.totalorder %s1963_s21, 0 }
  0x46   : > { %p2046_p9 = pnand %p2614_p5, %p2613_p1  ;;  %p54_p13 = scmp.ne.s32.totalorder %s1792_s9, %s1788_s8 }
  0x47   : > { %s2055_s11 = scalar_select %p2616_p12, %s1792_s9, %s47_s7  }
  0x48   : > { %p60_p3 = scmp.ne.s32.totalorder %s1788_s8, %s1784_s30  ;;  %p238_p6 = scmp.eq.s32.totalorder %s1944_s15, 3 }
  0x49   : > { %2617 = sst [smem:[#allocation21_spill]] %s2055_s11  ;;  %p244_p0 = scmp.eq.s32.totalorder %s1307_s4, 3 }
  0x4a   : > { %p2618_p4 = scmp.eq.s32.totalorder %s1812_s14, 0  ;;  %p2619_p7 = scmp.eq.s32.totalorder %s1944_s15, 0 }
  0x4b   : > { %p2070_p2 = por %p238_p6, %p54_p13  ;;  %p2074_p1 = por %p244_p0, %p60_p3 }
  0x4c   : > { %p56_p10 = por %p2618_p4, %p54_p13  ;;  %p2066_p11 = por %p2619_p7, %p60_p3 }
  0x4d   : > { %s2621_s10 = scalar_select %p2070_p2, 1, 0 }
  0x4e   : > { %s2620_s3 = scalar_select %p2066_p11, 1, 0 }
  0x4f   : > { %s2622_s21 = scalar_select %p2074_p1, 1, 0 }
  0x50   : > { %s276_s19 = sand.u32 1, %s1792_s9   ;;  %s285_s7 = sadd.s32 %s1804_s12, %s1313_s18 }
  0x51   : > { %2623 = sst [smem:[#allocation22_spill]] %s2622_s21  ;;  %s1312_s6 = sshll.u32 %s276_s19, 4 }
  0x52   : > { %s1314_s4 = sshll.u32 %s285_s7, 7  ;;  %s2624_s0 = sld [smem:[#allocation23_spill]] }
  0x53   : > { %s280_s11 = scalar_lea.vmem [#allocation2], %s1312_s6  ;;  %p2625_p5 = scmp.lt.s32.totalorder %s1812_s14, 4 }
  0x54   : > { %s288_s17 = sshll.u32 %s280_s11, 4  ;;  %s2095_s18 = scalar_lea.sflag [#allocation3], %s276_s19  ;;  %s2087_s17 = int_to_ptr.vmem [resolvable:$true] %s288_s17 }
  0x55   : > { %p2091_p12 = pnand %p2625_p5, %p56_p10 }
  0x57   : > { %p1596_p3 = pneg %p2091_p12 }
  0x58   : > { %s2085_s1 = scalar_lea.hbm %s2624_s0, %s1314_s4  ;;  %s1599_s11 = scalar_lea.hbm %s2624_s0, 1024 }
  0x59   : > { %s1594_s16 = scalar_lea.hbm %s2085_s1, 256  ;;  %p1600_p4 = scmp.lt.u32.totalorder %s2085_s1, %s2624_s0 }
  0x5a   : > { %p1595_p13 = scmp.ne.s32.totalorder %s2085_s1, %s1594_s16  ;;  %p1601_p10 = scmp.lt.u32.totalorder %s1599_s11, %s1594_s16 }
  0x5b   : > { %p1603_p5 = scmp.lt.u32.totalorder %s1594_s16, %s2085_s1 }
  0x5c   : > { %p1597_p6 = pnand %p1596_p3, %p1595_p13  ;;  %p1602_p7 = por %p1601_p10, %p1600_p4 }
  0x5e   : > { %p1598_p0 = pneg %p1597_p6  ;;  %p1604_p1 = por %p1603_p5, %p1602_p7 }
  0x60   : > { %p1605_p2 = pnand %p1604_p1, %p1598_p0 }
  0x62   : > { %1608 = shalt.err (!%p1605_p2)
}
  0x63   : > { %s1609_s19 = scalar_lea.vmem %s2087_s17, 256  ;;  %s1818_s6 = smov [#allocation2]  }
  0x64   : > { %p1610_p13 = scmp.ne.s32.totalorder %s2087_s17, %s1609_s19  ;;  %s1614_s22 = sshll.u32 %s1818_s6, 4  ;;  %s1615_s22 = int_to_ptr.vmem [resolvable:$false] %s1614_s22 }
  0x65   : > { %s1616_s7 = scalar_lea.vmem %s1615_s22, 512  ;;  %p1617_p11 = scmp.lt.s32.totalorder %s2087_s17, %s1615_s22 }
  0x66   : > { %p1612_p6 = pnand %p1610_p13, %p1596_p3  ;;  %p1618_p4 = scmp.lt.s32.totalorder %s1616_s7, %s1609_s19 }
  0x68   : > { %p1613_p8 = pneg %p1612_p6  ;;  %p1619_p10 = por %p1618_p4, %p1617_p11 }
  0x6a   : > { %p1620_p7 = pnand %p1619_p10, %p1613_p8 }
  0x6c   : > { %1623 = shalt.err (!%p1620_p7)
}
  0x6d   : > { %s2627_s16 = smov 8   ;;  %s2628_s11 = smov 128  }
  0x6e   : > { %s2629_s4 = smov 256   ;;  %s115_s9 = sadd.s32 1, %s1768_s26 }
  0x6f   : > { %1414 = dma.hbm_to_vmem [thread:$0]  (!%p2091_p12), %s2085_s1, 256, %s2087_s17, %s2095_s18, %s2629_s4, %s2628_s11, %s2627_s16  }
  0x70   : > { %p122_p8 = scmp.ne.s32.totalorder %s1768_s26, %s1764_s25  ;;  %p128_p11 = scmp.ne.s32.totalorder %s1764_s25, %s1760_s24 }
  0x71   : > { %s325_s19 = sand.u32 1, %s1768_s26   ;;  %p2630_p2 = scmp.eq.s32.totalorder %s1812_s14, 0 }
  0x72   : > { %p2631_p3 = scmp.eq.s32.totalorder %s1944_s15, 0  ;;  %s1319_s22 = sshll.u32 %s325_s19, 4 }
  0x73   : > { %p124_p1 = por %p122_p8, %p2630_p2  ;;  %s2633_s7 = sshll.u32 %s1808_s13, 9 }
  0x74   : > { %p2136_p0 = por %p128_p11, %p2631_p3  ;;  %s1756_s0 = sadd.s32 128, %s2633_s7 }
  0x75   : > { %s327_s12 = scalar_lea.vmem [#allocation7], %s1319_s22  ;;  %p2634_p5 = scmp.eq.s32.totalorder %s1960_s20, 0 }
  0x76   : > { %s2632_s6 = scalar_select %p2136_p0, 1, 0 }
  0x77   : > { %s338_s29 = sshll.u32 %s327_s12, 4  ;;  %s2150_s24 = scalar_lea.hbm %s2562_s2, %s1756_s0  ;;  %s2152_s29 = int_to_ptr.vmem [resolvable:$true] %s338_s29 }
  0x78   : > { %s2145_s21 = scalar_select %p2634_p5, %s1768_s26, %s115_s9  }
  0x79   : > { %p2635_p12 = scmp.lt.s32.totalorder %s1812_s14, 4  ;;  %s1624_s12 = scalar_lea.hbm %s2150_s24, 256 }
  0x7a   : > { %p1625_p6 = scmp.ne.s32.totalorder %s2150_s24, %s1624_s12  ;;  %s1629_s9 = scalar_lea.hbm %s2562_s2, 1024 }
  0x7b   : > { %p2156_p13 = pnand %p2635_p12, %p124_p1  ;;  %p1630_p8 = scmp.lt.u32.totalorder %s2150_s24, %s2562_s2 }
  0x7c   : > { %p1631_p11 = scmp.lt.u32.totalorder %s1629_s9, %s1624_s12  ;;  %p1633_p1 = scmp.lt.u32.totalorder %s1624_s12, %s2150_s24 }
  0x7d   : > { %p1626_p4 = pneg %p2156_p13 }
  0x7e   : > { %p1632_p2 = por %p1631_p11, %p1630_p8 }
  0x7f   : > { %p1627_p10 = pnand %p1626_p4, %p1625_p6 }
  0x80   : > { %p1634_p3 = por %p1633_p1, %p1632_p2 }
  0x81   : > { %p1628_p7 = pneg %p1627_p10 }
  0x83   : > { %p1635_p5 = pnand %p1634_p3, %p1628_p7 }
  0x85   : > { %1638 = shalt.err (!%p1635_p5)
}
  0x86   : > { %s1639_s7 = scalar_lea.vmem %s2152_s29, 256  ;;  %s1819_s1 = smov [#allocation7]  }
  0x87   : > { %p1640_p12 = scmp.ne.s32.totalorder %s2152_s29, %s1639_s7  ;;  %s1644_s17 = sshll.u32 %s1819_s1, 4  ;;  %s1645_s17 = int_to_ptr.vmem [resolvable:$false] %s1644_s17 }
  0x88   : > { %s1646_s0 = scalar_lea.vmem %s1645_s17, 512  ;;  %p1647_p0 = scmp.lt.s32.totalorder %s2152_s29, %s1645_s17 }
  0x89   : > { %p1642_p6 = pnand %p1640_p12, %p1626_p4  ;;  %p1648_p8 = scmp.lt.s32.totalorder %s1646_s0, %s1639_s7 }
  0x8b   : > { %p1643_p10 = pneg %p1642_p6  ;;  %p1649_p11 = por %p1648_p8, %p1647_p0 }
  0x8d   : > { %p1650_p2 = pnand %p1649_p11, %p1643_p10 }
  0x8f   : > { %1653 = shalt.err (!%p1650_p2)
}
  0x90   : > { %1420 = dma.hbm_to_vmem [thread:$0]  (!%p2156_p13), %s2150_s24, 256, %s2152_s29, %s2011_s5, %s2629_s4, %s2628_s11, %s2627_s16  }
  0x91   : > { %350 = sbr.rel (%p2046_p9) target bundleno = 1396 (0x574), region = 48  ;;  %s2192_s12 = sand.u32 (!%p2046_p9), 1, %s1788_s8  }
  0x92   : > { %s1323_s20 = sshll.u32 (!%p2046_p9), %s2192_s12, 4  ;;  %s353_s9 = scalar_lea.sflag (!%p2046_p9), [#allocation3], %s2192_s12 }
  0x93   : > { %s2196_s19 = scalar_lea.vmem (!%p2046_p9), [#allocation2], %s1323_s20  ;;  %p2637_p0 = scmp.ne.s32.totalorder (!%p2046_p9), %s2620_s3, 0 }
  0x98   : > { %1739 = dma.done.wait (%p2637_p0), %s353_s9, 256  }
  0x99   : > { %1741 = vsyncadd (%p2637_p0), %s353_s9, 4294967040  ;;  %s361_s29 = sand.u32 1, %s1944_s15   ;;  %s363_s5 = sand.u32 1, %s1776_s28  }
  0x9a   : > { %s2204_s27 = sshll.u32 %s363_s5, 4  ;;  %s362_s16 = scalar_lea.sflag [#allocation6], %s361_s29 }
  0x9b   : > { %s365_s11 = scalar_lea.vmem [#allocation5], %s2204_s27  ;;  %p2638_p9 = scmp.ne.s32.totalorder %s2609_s23, 0 }
  0x9d   : > { %1743 = dma.done.wait (%p2638_p9), %s362_s16, 256  }
  0x9e   : > { %1745 = vsyncadd (%p2638_p9), %s362_s16, 4294967040  ;;  %s372_s4 = sand.u32 1, %s1764_s25   ;;  %p2639_p13 = scmp.ne.s32.totalorder %s2632_s6, 0 }
  0x9f   : > { %s1325_s3 = sshll.u32 %s372_s4, 4 }
  0xa0   : > { %s374_s24 = scalar_lea.vmem [#allocation7], %s1325_s3 }
  0xa1   : > { %1747 = dma.done.wait (%p2639_p13), %s362_s16, 256  }
  0xa2   : > { %1749 = vsyncadd (%p2639_p13), %s362_s16, 4294967040  ;;  %s2640_s15 = sld [smem:[#allocation15_spill]]  ;;  %v465_v0 = vlaneseq  ;;  %v1820_v1 = vmov 0   ;;  %v2222_v9 = vld [vmem:[%s2196_s19] sm:$0xff]  ;;  %v425_v10 = vld [vmem:[%s2196_s19 + $0x8] sm:$0xff]  ;;  %s1821_s6 = smov 33  }
  0xa3   : > { %655 = vmatprep.mubr.bf16.mxu0 %v1820_v1  ;;  %1556 = vset.pattern.permute.xlu1 %v1820_v1  ;;  %v429_v11 = vld [vmem:[%s374_s24] sm:$0xff]  ;;  %v442_v14 = vpack.c.bf16 %v425_v10, %v2222_v9  ;;  %v430_v15 = vld [vmem:[%s374_s24 + $0x8] sm:$0xff]  ;;  %s1822_s22 = smov 18   ;;  %s1823_s7 = smov 34   ;;  %vm456_vm12 = vcmask 269312   ;;  %vm462_vm13 = vcmask 531456  }
  0xa4   : > { %v466_v2 = vand.u32 127, %v465_v0  ;;  %1557 = vset.pattern.permute.xlu0 %v1820_v1  ;;  %v503_v6 = vshrl.u32 %v465_v0, 7  ;;  %v426_v17 = vld [vmem:[%s365_s11] sm:$0xff]  ;;  %v431_v20 = vpack.c.bf16 %v430_v15, %v429_v11  ;;  %v427_v21 = vld [vmem:[%s365_s11 + $0x8] sm:$0xff]  ;;  %s1824_s1 = smov 16   ;;  %vm452_vm14 = vcmask 7168  }
  0xa5   : > { %447 = vrot.lane.b32.xlu0 %v442_v14, %s1821_s6  ;;  %v428_v23 = vpack.c.bf16 %v427_v21, %v426_v17  ;;  %s1825_s17 = smov 127   ;;  %vm577_vm15 = vcmask 146432   ;;  %s1826_s0 = smov 126  }
  0xa6   : > { %v467_v4 = vadd.s32 128, %v466_v2  ;;  %v472_v5 = vand.u32 15, %v466_v2  ;;  %vm846_vm1 = vcmp.lt.s32.totalorder %v466_v2, 16  ;;  %v2246_v19 = vsub.s32 0, %v503_v6  ;;  %s1827_s20 = smov 2   ;;  %s1828_s9 = smov 32  }
  0xa7   : > { %v508_v24 = vsub.s32 4, %v503_v6  ;;  %s1829_s19 = smov 112   ;;  %s1830_s29 = smov 96  }
  0xa8   : > { %p437_p4 = scmp.eq.s32.totalorder %s2640_s15, 1  ;;  %p432_p7 = scmp.eq.s32.totalorder %s2640_s15, 0  ;;  %v479_v8 = vand.u32 15, %v467_v4  ;;  %vm859_vm0 = vcmp.ge.s32.totalorder %v467_v4, 144  ;;  %vm2229_vm3 = vcmp.ne.s32.totalorder %v472_v5, 15  ;;  %vm2262_vm9 = vcmp.ne.s32.totalorder %v472_v5, 0 }
  0xa9   : > { %s2653_s16 = sld [smem:[#allocation26_spill]]  ;;  %s2658_s4 = sld [smem:[#allocation16_spill]] }
  0xaa   : > { %s438_s23 = scalar_select %p437_p4, 1, 0  ;;  %vm515_vm6 = vcmp.ne.s32.totalorder %v479_v8, 15  ;;  %vm495_vm10 = vcmp.ne.s32.totalorder %v479_v8, 0 }
  0xab   : > { %s433_s18 = scalar_select %p432_p7, 1, 0  ;;  %vm520_vm8 = vmpackc.low %vm515_vm6, %vm2229_vm3 }
  0xac   : > { %v439_v3 = vstv %s438_s23  ;;  %v521_v26 = vsel %vm520_vm8, 65537, %v1820_v1  ;;  %vm500_vm11 = vmpackc.low %vm495_vm10, %vm2262_vm9  ;;  %s2654_s23 = sld [smem:[#allocation25_spill]]  ;;  %p2660_p3 = scmp.ne.s32.totalorder %s2621_s10, 0 }
  0xad   : > { %v434_v7 = vstv %s433_s18  ;;  %vm2225_vm2 = vcmp.eq.s32.totalorder %v439_v3, 1  ;;  %v525_v29 = vrot.slane %v521_v26, %v2246_v19  ;;  %v529_v30 = vrot.slane %v521_v26, %v508_v24  ;;  %s1326_s18 = sshll.u32 %s2192_s12, 2 }
  0xae   : > { %vm2236_vm4 = vmand %vm859_vm0, %vm2225_vm2  ;;  %vm2242_vm5 = vcmp.eq.s32.totalorder %v434_v7, 1  ;;  %v441_v25 = vsel %vm2225_vm2, 0, %v431_v20  ;;  %v501_v31 = vsel %vm500_vm11, 65537, %v1820_v1  ;;  %vm734_vm2 = vcmask 277504  }
  0xaf   : > { %vm2253_vm7 = vmand %vm846_vm1, %vm2242_vm5  ;;  %450 = vrot.lane.b32.xlu1 %v441_v25, %s1821_s6  ;;  %v436_v28 = vsel %vm2242_vm5, 0, %v428_v23  ;;  %v2276_v32 = vrot.slane %v501_v31, %v2246_v19  ;;  %v2279_v33 = vrot.slane %v501_v31, %v508_v24  ;;  %vm567_vm5 = vcmask 130048   ;;  %v826_v18 = vld [vmem:[%s2653_s16] sm:$0xff]  ;;  %v827_v20 = vld [vmem:[%s2653_s16 + $0x8] sm:$0xff] }
  0xb0   : > { %444 = vrot.lane.b32.xlu0 %v436_v28, %s1821_s6  ;;  %s1349_s6 = sshll.u32 %s2658_s4, 1 }
  0xb1   : > { %s1170_s5 = sadd.s32 %s2640_s15, %s1349_s6  ;;  %s1159_s15 = scalar_lea.sflag [#allocation4], %s2192_s12 }
  0xb2   : > { %s1350_s27 = sshll.u32 %s1170_s5, 6 }
  0xb3   : > { %573 = vrot.lane.b32.xlu1 %v525_v29, %s1822_s22 }
  0xb4   : > { %575 = vrot.lane.b32.xlu0 %v529_v30, %s1822_s22 }
  0xb7   : > { %730 = vrot.lane.b32.xlu1 %v525_v29, %s1823_s7 }
  0xb8   : > { %732 = vrot.lane.b32.xlu0 %v529_v30, %s1823_s7 }
  0xbb   : > { %563 = vrot.lane.b32.xlu1 %v2276_v32, %s1824_s1 }
  0xbc   : > { %565 = vrot.lane.b32.xlu0 %v2279_v33, %s1824_s1 }
 0x117   : > { %v448_v34 = vpop.permute.xlu0 %447 }
 0x121   : > { %v451_v35 = vpop.permute.xlu1 %450 }
 0x122   : > { %v461_v36 = vsel %vm456_vm12, %v448_v34, %v451_v35  ;;  %v445_v38 = vpop.permute.xlu0 %444 }
 0x123   : > { %v2286_v37 = vsel %vm462_vm13, %v461_v36, 0  ;;  %v455_v39 = vsel %vm452_vm14, 0, %v445_v38  ;;  %vm546_vm13 = vcmask 1039360   ;;  %v1559_v36 = vld [vmem:[%s2654_s23] sm:$0xff]  }
 0x124   : > { %544 = vrot.lane.b32.xlu0 %v2286_v37, %s1825_s17  ;;  %v2292_v40 = vsel %vm456_vm12, %v455_v39, %v448_v34 }
 0x125   : > { %v574_v41 = vpop.permute.xlu1 %573  ;;  %542 = vrot.lane.b32.xlu1 %v2292_v40, %s1825_s17 }
 0x126   : > { %vm579_vm0 = vcmp.ne.s16.totalorder %v574_v41, 0  ;;  %v576_v42 = vpop.permute.xlu0 %575 }
 0x127   : > { %v578_v43 = vsel %vm577_vm15, %v574_v41, %v576_v42  ;;  %v581_v44 = vsel %vm579_vm0, %v2292_v40, 0  ;;  %vm556_vm15 = vcmask 1031168   ;;  %vm534_vm0 = vcmask 15360  }
 0x128   : > { %vm580_vm1 = vcmp.ne.s16.totalorder %v578_v43, 0 }
 0x129   : > { %585 = vrot.lane.b32.xlu1 %v581_v44, %s1826_s0  ;;  %v582_v45 = vsel %vm580_vm1, %v2286_v37, 0  ;;  %v731_v47 = vpop.permute.xlu1 %730  ;;  %v1560_v44 = vld [vmem:[%s2654_s23 + $0x10] sm:$0xff]  }
 0x12a   : > { %587 = vrot.lane.b32.xlu0 %v582_v45, %s1826_s0  ;;  %v733_v46 = vpop.permute.xlu0 %732  ;;  %vm736_vm6 = vcmp.ne.s16.totalorder %v731_v47, 0 }
 0x12b   : > { %v735_v48 = vsel %vm734_vm2, %v731_v47, %v733_v46  ;;  %v738_v52 = vsel %vm736_vm6, %v2292_v40, 0 }
 0x12c   : > { %vm737_vm8 = vcmp.ne.s16.totalorder %v735_v48, 0 }
 0x12d   : > { %530 = vrot.lane.b32.xlu1 %v525_v29, %s1827_s20  ;;  %v564_v50 = vpop.permute.xlu1 %563  ;;  %v739_v53 = vsel %vm737_vm8, %v2286_v37, 0  ;;  %v1558_v29 = vld [vmem:[%s2654_s23 + $0x8] sm:$0xff]  }
 0x12e   : > { %532 = vrot.lane.b32.xlu0 %v529_v30, %s1827_s20  ;;  %v566_v49 = vpop.permute.xlu0 %565  ;;  %vm569_vm10 = vcmp.ne.s16.totalorder %v564_v50, 0 }
 0x12f   : > { %v568_v51 = vsel %vm567_vm5, %v564_v50, %v566_v49  ;;  %v571_v54 = vsel %vm569_vm10, %v2292_v40, 0  ;;  %vm724_vm5 = vcmask 261120   ;;  %vm609_vm10 = vcmask 916480  }
 0x130   : > { %vm570_vm11 = vcmp.ne.s16.totalorder %v568_v51, 0 }
 0x131   : > { %720 = vrot.lane.b32.xlu1 %v2276_v32, %s1828_s9  ;;  %v572_v55 = vsel %vm570_vm11, %v2286_v37, 0  ;;  %vm511_vm11 = vcmp.ne.s16.totalorder %v2279_v33, 0 }
 0x132   : > { %722 = vrot.lane.b32.xlu0 %v2279_v33, %s1828_s9 }
 0x135   : > { %742 = vrot.lane.b32.xlu1 %v738_v52, %s1826_s0 }
 0x136   : > { %744 = vrot.lane.b32.xlu0 %v739_v53, %s1826_s0 }
 0x139   : > { %597 = vrot.lane.b32.xlu1 %v571_v54, %s1829_s19 }
 0x13a   : > { %599 = vrot.lane.b32.xlu0 %v572_v55, %s1829_s19 }
 0x196   : > { %v2314_v56 = vpop.permute.xlu0 %544 }
 0x197   : > { %603 = vrot.lane.b32.xlu0 %v2314_v56, %s1829_s19  ;;  %v543_v57 = vpop.permute.xlu1 %542 }
 0x198   : > { %v2320_v58 = vsel %vm546_vm13, %v543_v57, %v2314_v56 }
 0x199   : > { %601 = vrot.lane.b32.xlu1 %v2320_v58, %s1829_s19 }
 0x19b   : > { %v586_v59 = vpop.permute.xlu1 %585 }
 0x19c   : > { %v588_v60 = vpop.permute.xlu0 %587 }
 0x19d   : > { %607 = vrot.lane.b32.xlu0 %v588_v60, %s1829_s19  ;;  %v589_v61 = vsel %vm556_vm15, %v586_v59, %v588_v60 }
 0x19e   : > { %605 = vrot.lane.b32.xlu1 %v589_v61, %s1829_s19 }
 0x19f   : > { %v531_v62 = vpop.permute.xlu1 %530 }
 0x1a0   : > { %vm536_vm1 = vcmp.ne.s16.totalorder %v531_v62, 0  ;;  %v533_v63 = vpop.permute.xlu0 %532 }
 0x1a1   : > { %v535_v0 = vsel %vm534_vm0, %v531_v62, %v533_v63  ;;  %v538_v2 = vsel %vm536_vm1, %v2292_v40, 0  ;;  %vm619_vm0 = vcmask 392192   ;;  %vm510_vm1 = vcmp.ne.s16.totalorder %v2276_v32, 0 }
 0x1a2   : > { %vm537_vm2 = vcmp.ne.s16.totalorder %v535_v0, 0  ;;  %552 = vrot.lane.b32.xlu1 %v538_v2, %s1826_s0  ;;  %v512_v30 = vsel %vm510_vm1, %v2292_v40, 0 }
 0x1a3   : > { %v721_v3 = vpop.permute.xlu1 %720  ;;  %v539_v4 = vsel %vm537_vm2, %v2286_v37, 0  ;;  %vm766_vm2 = vcmask 785408  }
 0x1a4   : > { %vm726_vm6 = vcmp.ne.s16.totalorder %v721_v3, 0  ;;  %554 = vrot.lane.b32.xlu0 %v539_v4, %s1826_s0  ;;  %v723_v5 = vpop.permute.xlu0 %722 }
 0x1a5   : > { %v725_v6 = vsel %vm724_vm5, %v721_v3, %v723_v5  ;;  %v728_v7 = vsel %vm726_vm6, %v2292_v40, 0  ;;  %vm896_vm5 = vmpackc.low %vm2229_vm3, %vm2229_vm3 }
 0x1a6   : > { %vm727_vm8 = vcmp.ne.s16.totalorder %v725_v6, 0  ;;  %754 = vrot.lane.b32.xlu1 %v728_v7, %s1830_s29  ;;  %v897_v45 = vsel %vm896_vm5, 65537, %v1820_v1  ;;  %vm888_vm6 = vmpackc.low %vm2262_vm9, %vm2262_vm9  ;;  %vm1833_vm9 = vmmov 0  }
 0x1a7   : > { %v743_v8 = vpop.permute.xlu1 %742  ;;  %v729_v10 = vsel %vm727_vm8, %v2286_v37, 0  ;;  %v901_v46 = vrot.slane %v897_v45, %v2246_v19  ;;  %v889_v47 = vsel %vm888_vm6, 65537, %v1820_v1 }
 0x1a8   : > { %756 = vrot.lane.b32.xlu0 %v729_v10, %s1830_s29  ;;  %v745_v11 = vpop.permute.xlu0 %744  ;;  %v2386_v48 = vrot.slane %v889_v47, %v2246_v19  ;;  %v1832_v10 = vmov 0.0  }
 0x1a9   : > { %v746_v15 = vsel %vm556_vm15, %v743_v8, %v745_v11  ;;  %1365 = vmatprep.subr.bf16.mxu1 %v1832_v10  ;;  %1371 = vmatprep.mubr.msk.bf16.mxu1 %vm1833_vm9, %v1832_v10 }
 0x1aa   : > { %758 = vrot.lane.b32.xlu1 %v2320_v58, %s1830_s29 }
 0x1ab   : > { %v598_v12 = vpop.permute.xlu1 %597 }
 0x1ac   : > { %760 = vrot.lane.b32.xlu0 %v2314_v56, %s1830_s29  ;;  %v600_v14 = vpop.permute.xlu0 %599 }
 0x1ad   : > { %623 = vmatprep.subr.bf16.mxu0 %v600_v14  ;;  %v610_v17 = vsel %vm609_vm10, %v598_v12, %v600_v14 }
 0x1ae   : > { %762 = vrot.lane.b32.xlu1 %v746_v15, %s1830_s29  ;;  %624 = vmatpush1.bf16.msra.mxu0 %v610_v17 }
 0x1b0   : > { %764 = vrot.lane.b32.xlu0 %v745_v11, %s1830_s29 }
 0x1b2   : > { %830 = vperm.xlu1 %1556, %v826_v18  }
 0x1b4   : > { %835 = vperm.xlu0 %1557, %v827_v20  }
 0x1b8   : > { %931 = vrot.lane.b32.xlu0 %v901_v46, %s1822_s22  ;;  %s1831_s22 = smov 1  }
 0x1bc   : > { %926 = vrot.lane.b32.xlu0 %v2386_v48, %s1824_s1 }
 0x209   : > { %v604_v21 = vpop.permute.xlu0 %603 }
 0x20a   : > { %625 = vmatprep.subr.bf16.mxu0 %v604_v21 }
 0x20b   : > { %v602_v23 = vpop.permute.xlu1 %601 }
 0x20c   : > { %v611_v24 = vsel %vm609_vm10, %v602_v23, %v604_v21 }
 0x20d   : > { %626 = vmatpush1.bf16.msra.mxu0 %v611_v24 }
 0x20f   : > { %v608_v25 = vpop.permute.xlu0 %607 }
 0x210   : > { %v606_v26 = vpop.permute.xlu1 %605  ;;  %627 = vmatprep.subr.bf16.mxu0 %v608_v25 }
 0x211   : > { %v612_v28 = vsel %vm609_vm10, %v606_v26, %v608_v25 }
 0x212   : > { %628 = vmatpush1.bf16.msra.mxu0 %v612_v28 }
 0x213   : > { %1332 = vmatprep.subr.msk.bf16.mxu0 %vm511_vm11, %v2286_v37 }
 0x214   : > { %v553_v31 = vpop.permute.xlu1 %552 }
 0x215   : > { %1330 = vmatmul.mubr.msk.bf16.vlgmr.msra.gmra.mrb[0].mxu0 %vm619_vm0, %v1558_v29 }
 0x216   : > { %675 = vmatpush1.bf16.msra.mxu0 %v512_v30  ;;  %v555_v34 = vpop.permute.xlu0 %554  ;;  %706 = vmatprep.mubr.bf16.mxu0 %v1820_v1 }
 0x217   : > { %676 = vmatprep.subr.bf16.mxu0 %v2314_v56  ;;  %v557_v32 = vsel %vm556_vm15, %v553_v31, %v555_v34 }
 0x218   : > { %v755_v35 = vpop.permute.xlu1 %754 }
 0x21a   : > { %677 = vmatpush1.bf16.msra.mxu0 %v2320_v58  ;;  %v757_v33 = vpop.permute.xlu0 %756 }
 0x21b   : > { %678 = vmatprep.subr.bf16.mxu0 %v555_v34  ;;  %v767_v38 = vsel %vm766_vm2, %v755_v35, %v757_v33 }
 0x21c   : > { %v759_v39 = vpop.permute.xlu1 %758 }
 0x21e   : > { %679 = vmatpush1.bf16.msra.mxu0 %v557_v32  ;;  %v761_v37 = vpop.permute.xlu0 %760 }
 0x21f   : > { %779 = vmatprep.subr.bf16.mxu0 %v757_v33  ;;  %v768_v40 = vsel %vm766_vm2, %v759_v39, %v761_v37 }
 0x220   : > { %v763_v42 = vpop.permute.xlu1 %762 }
 0x221   : > { %1333 = vmatmul.mubr.msk.bf16.vlgmr.msra.gmra.mrb[0].mxu0 %vm619_vm0, %v1559_v36 }
 0x222   : > { %780 = vmatpush1.bf16.msra.mxu0 %v767_v38  ;;  %811 = vmatprep.mubr.bf16.mxu0 %v1820_v1  ;;  %v765_v41 = vpop.permute.xlu0 %764 }
 0x223   : > { %781 = vmatprep.subr.bf16.mxu0 %v761_v37  ;;  %v769_v43 = vsel %vm766_vm2, %v763_v42, %v765_v41 }
 0x226   : > { %782 = vmatpush1.bf16.msra.mxu0 %v768_v40 }
 0x227   : > { %783 = vmatprep.subr.bf16.mxu0 %v765_v41 }
 0x22a   : > { %784 = vmatpush1.bf16.msra.mxu0 %v769_v43 }
 0x22d   : > { %1337 = vmatmul.mubr.msk.bf16.vlgmr.msra.gmra.mrb[0].mxu0 %vm619_vm0, %v1560_v44 }
 0x231   : > { %v831_v13 = vpop.permute.xlu1 %830 }
 0x233   : > { %v836_v50 = vpop.permute.xlu0 %835 }
 0x237   : > { %v932_v3 = vpop.permute.xlu0 %931 }
 0x238   : > { %vm933_vm3 = vcmp.ne.s16.totalorder %v932_v3, 0 }
 0x23b   : > { %v927_v11 = vpop.permute.xlu0 %926 }
 0x300   : > { %v813_v49 = vpop.f32.mrb[0].mxu0 }
 0x301   : > { %v838_v51 = vadd.f32 %v831_v13, %v813_v49  ;;  %v815_v52 = vpop.f32.mrb[1].mxu0 }
 0x302   : > { %v839_v53 = vadd.f32 %v831_v13, %v815_v52  ;;  %v817_v54 = vpop.f32.mrb[2].mxu0 }
 0x303   : > { %v842_v55 = vmax.f32 %v838_v51, 0.0  ;;  %v840_v56 = vadd.f32 %v836_v50, %v817_v54  ;;  %v819_v27 = vpop.f32.mrb[3].mxu0 }
 0x304   : > { %v843_v57 = vmax.f32 %v839_v53, 0.0  ;;  %v841_v58 = vadd.f32 %v836_v50, %v819_v27 }
 0x305   : > { %v854_v1 = vsel %vm2253_vm7, 0.0, %v842_v55  ;;  %v844_v19 = vmax.f32 %v840_v56, 0.0 }
 0x306   : > { %v867_v59 = vsel %vm2236_vm4, 0.0, %v843_v57  ;;  %v845_v60 = vmax.f32 %v841_v58, 0.0 }
 0x307   : > { %v856_v61 = vsel %vm2253_vm7, 0.0, %v844_v19  ;;  %vm928_vm7 = vcmp.ne.s16.totalorder %v927_v11, 0 }
 0x308   : > { %v869_v62 = vsel %vm2236_vm4, 0.0, %v845_v60  ;;  %v870_v63 = vpack.c.bf16 %v856_v61, %v854_v1 }
 0x309   : > { %v871_v0 = vpack.c.bf16 %v869_v62, %v867_v59 }
 0x30a   : > { %874 = vrot.lane.b32.xlu1 %v870_v63, %s1831_s22 }
 0x30e   : > { %876 = vrot.lane.b32.xlu1 %v871_v0, %s1831_s22  ;;  %s414_s22 = scalar_lea.vmem [#allocation8], %s1326_s18 }
 0x312   : > { %1067 = vrot.lane.b32.xlu1 %v901_v46, %s1823_s7  ;;  %s1174_s7 = sshll.u32 %s414_s22, 4  ;;  %s2484_s7 = int_to_ptr.vmem [resolvable:$true] %s1174_s7 }
 0x37c   : > { %v875_v2 = vpop.permute.xlu1 %874 }
 0x37d   : > { %v2400_v4 = vsel %vm452_vm14, 0, %v875_v2 }
 0x37e   : > { %909 = vrot.lane.b32.xlu1 %v2400_v4, %s1825_s17  ;;  %v934_v5 = vsel %vm933_vm3, %v2400_v4, 0  ;;  %v929_v14 = vsel %vm928_vm7, %v2400_v4, 0 }
 0x380   : > { %v877_v22 = vpop.permute.xlu1 %876 }
 0x381   : > { %v879_v16 = vsel %vm452_vm14, %v875_v2, %v877_v22 }
 0x382   : > { %v884_v6 = vsel %vm456_vm12, %v879_v16, 0  ;;  %938 = vrot.lane.b32.xlu1 %v934_v5, %s1826_s0 }
 0x383   : > { %911 = vrot.lane.b32.xlu0 %v884_v6, %s1825_s17  ;;  %v935_v8 = vsel %vm933_vm3, %v884_v6, 0  ;;  %v930_v17 = vsel %vm928_vm7, %v884_v6, 0  ;;  %s2655_s17 = sld [smem:[#allocation28_spill]] }
 0x384   : > { %v1068_v7 = vpop.permute.xlu1 %1067 }
 0x385   : > { %vm1069_vm4 = vcmp.ne.s16.totalorder %v1068_v7, 0 }
 0x386   : > { %902 = vrot.lane.b32.xlu1 %v901_v46, %s1827_s20  ;;  %v1070_v12 = vsel %vm1069_vm4, %v2400_v4, 0  ;;  %v1071_v15 = vsel %vm1069_vm4, %v884_v6, 0 }
 0x387   : > { %940 = vrot.lane.b32.xlu0 %v935_v8, %s1826_s0 }
 0x389   : > { %v1148_v39 = vld [vmem:[%s2655_s17] sm:$0xff] }
 0x38a   : > { %1074 = vrot.lane.b32.xlu1 %v1070_v12, %s1826_s0 }
 0x38b   : > { %1062 = vrot.lane.b32.xlu0 %v2386_v48, %s1828_s9  ;;  %s2656_s9 = sld [smem:[#allocation27_spill]] }
 0x38e   : > { %950 = vrot.lane.b32.xlu1 %v929_v14, %s1829_s19 }
 0x38f   : > { %1076 = vrot.lane.b32.xlu0 %v1071_v15, %s1826_s0 }
 0x391   : > { %v1561_v46 = vld [vmem:[%s2656_s9 + $0x8] sm:$0xff]  }
 0x393   : > { %952 = vrot.lane.b32.xlu0 %v930_v17, %s1829_s19 }
 0x3f0   : > { %v910_v18 = vpop.permute.xlu1 %909 }
 0x3f4   : > { %v939_v20 = vpop.permute.xlu1 %938 }
 0x3f5   : > { %v912_v21 = vpop.permute.xlu0 %911 }
 0x3f6   : > { %956 = vrot.lane.b32.xlu0 %v912_v21, %s1829_s19  ;;  %v913_v23 = vsel %vm546_vm13, %v910_v18, %v912_v21  ;;  %vm894_vm13 = vcmp.ne.s16.totalorder %v2386_v48, 0 }
 0x3f7   : > { %954 = vrot.lane.b32.xlu1 %v913_v23, %s1829_s19  ;;  %v895_v49 = vsel %vm894_vm13, %v2400_v4, 0 }
 0x3f8   : > { %v903_v24 = vpop.permute.xlu1 %902 }
 0x3f9   : > { %v941_v25 = vpop.permute.xlu0 %940  ;;  %vm904_vm12 = vcmp.ne.s16.totalorder %v903_v24, 0 }
 0x3fa   : > { %960 = vrot.lane.b32.xlu0 %v941_v25, %s1829_s19  ;;  %v942_v26 = vsel %vm556_vm15, %v939_v20, %v941_v25  ;;  %v906_v28 = vsel %vm904_vm12, %v884_v6, 0  ;;  %v905_v30 = vsel %vm904_vm12, %v2400_v4, 0 }
 0x3fb   : > { %958 = vrot.lane.b32.xlu1 %v942_v26, %s1829_s19  ;;  %s2657_s19 = smov %s2656_s9  ;;  %s1654_s9 = scalar_lea.vmem %s2484_s7, 64 }
 0x3fc   : > { %v1075_v31 = vpop.permute.xlu1 %1074  ;;  %v1562_v52 = vld [vmem:[%s2657_s19] sm:$0xff]   ;;  %v1563_v1 = vld [vmem:[%s2657_s19 + $0x10] sm:$0xff]   ;;  %p1655_p1 = scmp.ne.s32.totalorder %s2484_s7, %s1654_s9 }
 0x3fd   : > { %v1063_v29 = vpop.permute.xlu0 %1062 }
 0x3fe   : > { %vm1064_vm14 = vcmp.ne.s16.totalorder %v1063_v29, 0  ;;  %919 = vrot.lane.b32.xlu0 %v906_v28, %s1826_s0  ;;  %p1656_p5 = pnand %p1655_p1, %p2660_p3 }
 0x3ff   : > { %917 = vrot.lane.b32.xlu1 %v905_v30, %s1826_s0  ;;  %v1066_v34 = vsel %vm1064_vm14, %v884_v6, 0  ;;  %v1065_v35 = vsel %vm1064_vm14, %v2400_v4, 0  ;;  %s2659_s0 = sld [smem:[#allocation29_spill]] }
 0x400   : > { %v951_v32 = vpop.permute.xlu1 %950  ;;  %p1657_p12 = pneg %p1656_p5 }
 0x401   : > { %v1077_v33 = vpop.permute.xlu0 %1076 }
 0x402   : > { %1088 = vrot.lane.b32.xlu0 %v1066_v34, %s1830_s29  ;;  %v1078_v38 = vsel %vm556_vm15, %v1075_v31, %v1077_v33 }
 0x403   : > { %1086 = vrot.lane.b32.xlu1 %v1065_v35, %s1830_s29 }
 0x405   : > { %v953_v36 = vpop.permute.xlu0 %952  ;;  %s2482_s20 = scalar_lea.hbm %s2659_s0, %s1350_s27 }
 0x406   : > { %1092 = vrot.lane.b32.xlu0 %v912_v21, %s1830_s29  ;;  %v962_v37 = vsel %vm609_vm10, %v951_v32, %v953_v36 }
 0x407   : > { %1090 = vrot.lane.b32.xlu1 %v913_v23, %s1830_s29  ;;  %1366 = vmatpush3.bf16.msra.mxu1 %v962_v37 }
 0x408   : > { %1367 = vmatprep.subr.bf16.mxu1 %v1832_v10 }
 0x40a   : > { %1096 = vrot.lane.b32.xlu0 %v1077_v33, %s1830_s29 }
 0x40b   : > { %1094 = vrot.lane.b32.xlu1 %v1078_v38, %s1830_s29  ;;  %s1834_s29 = smov [#allocation8]  }
 0x40c   : > { %s1658_s11 = sshll.u32 %s1834_s29, 4  ;;  %s1659_s11 = int_to_ptr.vmem [resolvable:$false] %s1658_s11 }
 0x40d   : > { %s1660_s4 = scalar_lea.vmem %s1659_s11, 128  ;;  %p1661_p6 = scmp.lt.s32.totalorder %s2484_s7, %s1659_s11 }
 0x40e   : > { %p1662_p10 = scmp.lt.s32.totalorder %s1660_s4, %s1654_s9 }
 0x40f   : > { %1151 = vperm.xlu1 %1556, %v1148_v39  }
 0x410   : > { %p1663_p8 = por %p1662_p10, %p1661_p6 }
 0x412   : > { %p1664_p11 = pnand %p1663_p8, %p1657_p12 }
 0x468   : > { %v957_v40 = vpop.permute.xlu0 %956 }
 0x469   : > { %v955_v41 = vpop.permute.xlu1 %954 }
 0x46a   : > { %v963_v42 = vsel %vm609_vm10, %v955_v41, %v957_v40 }
 0x46b   : > { %1368 = vmatpush3.bf16.msra.mxu1 %v963_v42 }
 0x46c   : > { %v961_v43 = vpop.permute.xlu0 %960  ;;  %1369 = vmatprep.subr.bf16.mxu1 %v1832_v10 }
 0x46d   : > { %v959_v44 = vpop.permute.xlu1 %958 }
 0x46e   : > { %v964_v45 = vsel %vm609_vm10, %v959_v44, %v961_v43 }
 0x46f   : > { %1370 = vmatpush3.bf16.msra.mxu1 %v964_v45 }
 0x470   : > { %1375 = vmatprep.subr.bf16.mxu1 %v1832_v10  ;;  %v920_v47 = vpop.permute.xlu0 %919 }
 0x471   : > { %v918_v13 = vpop.permute.xlu1 %917 }
 0x472   : > { %1372 = vmatmul.mubr.msk.bf16.vlgmr.msra.gmra.mrb[0].mxu1 %vm619_vm0, %v1561_v46  ;;  %v921_v48 = vsel %vm556_vm15, %v918_v13, %v920_v47 }
 0x473   : > { %1376 = vmatpush3.bf16.msra.mxu1 %v895_v49  ;;  %1381 = vmatprep.mubr.msk.bf16.mxu1 %vm1833_vm9, %v1832_v10 }
 0x474   : > { %1377 = vmatprep.subr.bf16.mxu1 %v1832_v10  ;;  %v1089_v50 = vpop.permute.xlu0 %1088 }
 0x475   : > { %v1087_v51 = vpop.permute.xlu1 %1086 }
 0x476   : > { %v1098_v55 = vsel %vm766_vm2, %v1087_v51, %v1089_v50 }
 0x477   : > { %1378 = vmatpush3.bf16.msra.mxu1 %v913_v23 }
 0x478   : > { %1379 = vmatprep.subr.bf16.mxu1 %v1832_v10  ;;  %v1093_v53 = vpop.permute.xlu0 %1092 }
 0x479   : > { %v1091_v54 = vpop.permute.xlu1 %1090 }
 0x47a   : > { %v1099_v56 = vsel %vm766_vm2, %v1091_v54, %v1093_v53 }
 0x47b   : > { %1380 = vmatpush3.bf16.msra.mxu1 %v921_v48 }
 0x47c   : > { %1385 = vmatprep.subr.bf16.mxu1 %v1832_v10  ;;  %v1097_v27 = vpop.permute.xlu0 %1096 }
 0x47d   : > { %v1095_v57 = vpop.permute.xlu1 %1094 }
 0x47e   : > { %1382 = vmatmul.mubr.msk.bf16.vlgmr.msra.gmra.mrb[4].mxu1 %vm619_vm0, %v1562_v52  ;;  %v1100_v58 = vsel %vm766_vm2, %v1095_v57, %v1097_v27 }
 0x47f   : > { %1386 = vmatpush3.bf16.msra.mxu1 %v1098_v55  ;;  %1391 = vmatprep.mubr.msk.bf16.mxu1 %vm1833_vm9, %v1832_v10 }
 0x480   : > { %1387 = vmatprep.subr.bf16.mxu1 %v1832_v10 }
 0x483   : > { %1388 = vmatpush3.bf16.msra.mxu1 %v1099_v56 }
 0x484   : > { %1389 = vmatprep.subr.bf16.mxu1 %v1832_v10 }
 0x487   : > { %1390 = vmatpush3.bf16.msra.mxu1 %v1100_v58 }
 0x48a   : > { %1392 = vmatmul.mubr.msk.bf16.vlgmr.msra.gmra.mrb[8].mxu1 %vm619_vm0, %v1563_v1 }
 0x48e   : > { %v1152_v5 = vpop.permute.xlu1 %1151 }
 0x545   : > { %v1005_v19 = vpop.f32.mrb[0].mxu1 }
 0x546   : > { %v1373_v59 = vpop.f32.mrb[1].mxu1 }
 0x547   : > { %v1008_v60 = vpop.f32.mrb[2].mxu1 }
 0x548   : > { %v1374_v61 = vpop.f32.mrb[3].mxu1 }
 0x551   : > { %v1053_v62 = vpop.f32.mrb[4].mxu1 }
 0x552   : > { %v1054_v63 = vadd.f32 %v1053_v62, %v1005_v19  ;;  %v1383_v0 = vpop.f32.mrb[5].mxu1 }
 0x553   : > { %v1056_v2 = vpop.f32.mrb[6].mxu1 }
 0x554   : > { %v1384_v3 = vpop.f32.mrb[7].mxu1 }
 0x55d   : > { %v1141_v4 = vpop.f32.mrb[8].mxu1 }
 0x55e   : > { %v1147_v22 = vadd.f32 %v1141_v4, %v1054_v63  ;;  %v1393_v16 = vpop.f32.mrb[9].mxu1 }
 0x55f   : > { %v1144_v6 = vpop.f32.mrb[10].mxu1 }
 0x560   : > { %v1154_v7 = vadd.f32 %v1152_v5, %v1147_v22  ;;  %v1394_v8 = vpop.f32.mrb[11].mxu1 }
 0x562   : > { %v1155_v10 = vmul.f32 0.1, %v1154_v7 }
 0x564   : > { %v1156_v11 = vadd.f32 %v1155_v10, %v2222_v9 }
 0x566   : > { %1157 = vst [vmem:[%s414_s22] sm:$0xf] %v1156_v11 }
 0x567   : > { %1667 = shalt.err (!%p1664_p11)
}
 0x568   : > { %s1668_s12 = scalar_lea.hbm %s2482_s20, 64  ;;  %s1672_s18 = scalar_lea.hbm %s2659_s0, 256 }
 0x569   : > { %p1669_p2 = scmp.ne.s32.totalorder %s2482_s20, %s1668_s12  ;;  %p1673_p13 = scmp.lt.u32.totalorder %s2482_s20, %s2659_s0 }
 0x56a   : > { %p1674_p4 = scmp.lt.u32.totalorder %s1672_s18, %s1668_s12  ;;  %p1676_p1 = scmp.lt.u32.totalorder %s1668_s12, %s2482_s20 }
 0x56b   : > { %p1670_p0 = pnand %p1669_p2, %p2660_p3 }
 0x56c   : > { %p1675_p7 = por %p1674_p4, %p1673_p13 }
 0x56d   : > { %p1671_p9 = pneg %p1670_p0 }
 0x56e   : > { %p1677_p5 = por %p1676_p1, %p1675_p7 }
 0x570   : > { %p1678_p12 = pnand %p1677_p5, %p1671_p9 }
 0x572   : > { %1681 = shalt.err (!%p1678_p12)
}
 0x573   : > { %1409 = dma.vmem_to_hbm [thread:$0]  (%p2660_p3), %s2484_s7, 64, %s2482_s20, %s1159_s15  }
 0x574 PF: > { %s2661_s27 = sld [smem:[#allocation22_spill]]  ;;  %p1426_p6 = scmp.ge.s32.totalorder %s1812_s14, 2 }
 0x575   : > { %s1186_s22 = sand.u32 1, %s1784_s30  }
 0x576   : > { %s1187_s1 = scalar_lea.sflag [#allocation4], %s1186_s22 }
 0x57a   : > { %p2662_p10 = scmp.ne.s32.totalorder %s2661_s27, 0 }
 0x57c   : > { %p1422_p8 = pnand %p1426_p6, %p2662_p10 }
 0x57e   : > { %1751 = dma.done.wait (!%p1422_p8), %s1187_s1, 64  }
 0x57f   : > { %1753 = vsyncadd (!%p1422_p8), %s1187_s1, 4294967232  ;;  %s26_s14 = sadd.s32 1, %s1812_s14   ;;  %s2664_s10 = sld [smem:[#allocation13_spill]] }
 0x580   : > { %p2513_p11 = scmp.ge.s32.totalorder %s26_s14, 6   ;;  %s2665_s29 = sld [smem:[#allocation20_spill]] }
 0x581   : > { %s2666_s7 = sld [smem:[#allocation14_spill]]  ;;  %s2667_s9 = sld [smem:[#allocation21_spill]] }
 0x582   : > { %s2668_s20 = sld [smem:[#allocation17_spill]]  ;;  %s2669_s12 = sld [smem:[#allocation18_spill]] }
 0x583   : > { %s2670_s15 = sld [smem:[#allocation19_spill]]  ;;  %s2671_s24 = smov %s1764_s25 }
 0x584   : > { %s2672_s25 = smov %s1768_s26  ;;  %s2673_s26 = smov %s2145_s21 }
 0x585   : > { %s2674_s27 = smov %s1776_s28  ;;  %s2675_s28 = smov %s2664_s10 }
 0x586   : > { %s2676_s30 = smov %s1788_s8  ;;  %s2679_s11 = smov %s1808_s13 }
 0x587   : > { %s2677_s8 = smov %s2666_s7  ;;  %25 = sbr.rel (!%p2513_p11) target bundleno = 20 (0x14), region = 121 }
 0x588   : > { %s2678_s10 = smov %s2668_s20 }
 0x589   : > { %s2680_s13 = smov %s2670_s15 }
 0x58e   :  { %1192 = vsyncpa [#allocation3], 1 }
 0x58f   :  { %1194 = vsyncpa [#allocation3 + $0x1], 1 }
 0x590   :  { %1195 = vsyncpa [#allocation6], 1 }
 0x591   :  { %1197 = vsyncpa [#allocation6 + $0x1], 1 }
 0x592   :  { %1198 = vsyncpa [#allocation4], 1 }
 0x593   :  { %1200 = vsyncpa [#allocation4 + $0x1], 1 }

</bundles_post_ra>
